<compile_context>
chip_gen: v7x
topology: tpu7x:2x2x1
jax: 0.10.0
libtpu: 0.0.40
codegen_flags: <defaults>
</compile_context>

<pallas_src>
import functools

import jax
import jax.numpy as jnp
import numpy as np
from jax.experimental import pallas as pl
from jax.experimental.pallas import tpu as pltpu

_LANE = 128                    # lane width
_NUM_STATS = 9                 # scalar statistics produced by kernel A
_NC = 2                        # leading "parallel" axis (2 TensorCores on v7x)
_SUB_MAX = 256                 # max sublanes per grid step (256*128 residues)
_COMP_IDX = (0, 4, 8, 1, 2, 5)  # xx, yy, zz, xy, xz, yz of a row-major 3x3


def _round_up(x, m):
    return ((x + m - 1) // m) * m


# --------------------------------------------------------------------------- #
# Kernel A: per-residue 3x3 covariance losses (masked reductions)             #
# --------------------------------------------------------------------------- #
def _resi_cov_kernel(pred_ref, true_ref, mask_ref, out_ref, acc_ref,
                     *cast_scratch, needs_cast):
    """pred_ref/true_ref: (6, SUB, 128) VMEM component-major symmetric
    covariances (xx, yy, zz, xy, xz, yz); mask_ref: (SUB, 128) f32 VMEM;
    out_ref: (1, 9, 128) f32 VMEM per-core lane-partial stats (written once in
    the epilogue); acc_ref: (9, SUB, 128) f32 VMEM scratch persisting across the
    'arbitrary' axis; cast_scratch: optional (12, SUB, 128) f32 VMEM used when
    inputs are narrower than f32."""
    i = pl.program_id(1)

    @pl.when(i == 0)
    def _init():
        acc_ref[...] = jnp.zeros_like(acc_ref)

    m = mask_ref[...].astype(jnp.float32)                        # (SUB, 128)

    if needs_cast:
        # Convert each component to f32 exactly once per step (repeated
        # narrow->f32 converts burn the VALU slot, the binding unit on v7x once
        # the tile is big enough); later uses re-load from VMEM (3 vld/cycle).
        cvt = cast_scratch[0]
        for k in range(6):
            cvt[k] = pred_ref[k].astype(jnp.float32)
            cvt[6 + k] = true_ref[k].astype(jnp.float32)

        def p(k):
            return cvt[k]

        def t(k):
            return cvt[6 + k]
    else:
        # f32 inputs: re-index the refs at each use site (keeps live vregs
        # bounded; VMEM reloads are cheap, spills are not).
        def p(k):
            return pred_ref[k]

        def t(k):
            return true_ref[k]

    # --- masked squared error / true-norm (symmetric: off-diagonals weighted 2x)
    sq_err = jnp.zeros_like(m)
    sq_true = jnp.zeros_like(m)
    for k in range(3):
        d = p(k) - t(k)
        tk = t(k)
        sq_err = sq_err + d * d
        sq_true = sq_true + tk * tk
    for k in range(3, 6):
        d = p(k) - t(k)
        tk = t(k)
        sq_err = sq_err + 2.0 * (d * d)
        sq_true = sq_true + 2.0 * (tk * tk)

    # --- KL(N(mu, Sigma_p) || N(mu, Sigma_t)): identical means, so only the
    # trace / logdet terms survive.  Cofactors of the (symmetric) true
    # covariance give det(true) and tr(true^{-1} pred) without materializing
    # the inverse.
    c00 = t(1) * t(2) - t(5) * t(5)
    c11 = t(0) * t(2) - t(4) * t(4)
    c22 = t(0) * t(1) - t(3) * t(3)
    c01 = t(4) * t(5) - t(3) * t(2)
    c02 = t(3) * t(5) - t(1) * t(4)
    c12 = t(3) * t(4) - t(0) * t(5)

    det_t = t(0) * c00 + t(3) * c01 + t(4) * c02
    tr_num = (c00 * p(0) + c11 * p(1) + c22 * p(2)
              + 2.0 * (c01 * p(3) + c02 * p(4) + c12 * p(5)))
    det_p = (p(0) * (p(1) * p(2) - p(5) * p(5))
             - p(3) * (p(3) * p(2) - p(4) * p(5))
             + p(4) * (p(3) * p(5) - p(1) * p(4)))

    safe_det_t = jnp.where(m > 0, det_t, 1.0)
    safe_det_p = jnp.where(m > 0, det_p, 1.0)
    # |det| matches slogdet behaviour if a prediction is numerically non-PD
    # (instead of NaN); tiny floor avoids log(0).  Single fused EUP log.
    logdet_ratio = jnp.log(jnp.abs(safe_det_t) /
                           jnp.maximum(jnp.abs(safe_det_p), 1e-30))
    kl = 0.5 * (tr_num / safe_det_t - 3.0 + logdet_ratio)

    # RMSF = sqrt(trace(cov)) per residue; Pearson raw-moment statistics.
    rmsf_t = jnp.sqrt(jnp.maximum(t(0) + t(1) + t(2), 0.0))
    rmsf_p = jnp.sqrt(jnp.maximum(p(0) + p(1) + p(2), 0.0))
    mrt = rmsf_t * m
    mrp = rmsf_p * m

    # Elementwise VMEM accumulation — cross-lane reductions happen once in the
    # epilogue, not per step.
    acc_ref[0] += sq_err * m
    acc_ref[1] += sq_true * m
    acc_ref[2] += m
    acc_ref[3] += kl * m
    acc_ref[4] += mrt
    acc_ref[5] += mrp
    acc_ref[6] += rmsf_t * mrt
    acc_ref[7] += rmsf_p * mrp
    acc_ref[8] += rmsf_t * mrp

    @pl.when(i == pl.num_programs(1) - 1)
    def _finalize():
        # One-time sublane reduction; the remaining (NC, 9, 128) -> (9,) lane
        # reduction is a trivial JAX op in the wrapper.
        out_ref[0] = jnp.sum(acc_ref[...], axis=1)


def _resi_tiling(n_rows_raw):
    """Pick per-step sublane count and padded row count for kernel A."""
    per_core = -(-n_rows_raw // _NC)                       # ceil
    sub = max(8, min(_SUB_MAX, _round_up(per_core, 8)))
    n_rows = _round_up(max(n_rows_raw, 1), _NC * sub)
    return sub, n_rows


def _run_resi_cov_kernel(pred6, true6, mask2, sub):
    """pred6/true6: (6, n_rows, 128) native dtype; mask2: (n_rows, 128) f32."""
    n_rows = pred6.shape[1]
    spc = n_rows // (_NC * sub)                            # grid steps per core
    n_res = n_rows * _LANE
    needs_cast = (pred6.dtype != jnp.float32) or (true6.dtype != jnp.float32)
    itemsize = jnp.dtype(pred6.dtype).itemsize

    scratch = [pltpu.VMEM((_NUM_STATS, sub, _LANE), jnp.float32)]
    if needs_cast:
        scratch.append(pltpu.VMEM((12, sub, _LANE), jnp.float32))

    cost = pl.CostEstimate(
        flops=110 * n_res,
        transcendentals=3 * n_res,
        bytes_accessed=2 * 6 * n_res * itemsize + 4 * n_res
        + _NC * _NUM_STATS * _LANE * 4)

    out = pl.pallas_call(
        functools.partial(_resi_cov_kernel, needs_cast=needs_cast),
        out_shape=jax.ShapeDtypeStruct((_NC, _NUM_STATS, _LANE), jnp.float32),
        grid_spec=pltpu.PrefetchScalarGridSpec(
            num_scalar_prefetch=0,
            grid=(_NC, spc),
            in_specs=[
                pl.BlockSpec((6, sub, _LANE), lambda c, i: (0, c * spc + i, 0)),
                pl.BlockSpec((6, sub, _LANE), lambda c, i: (0, c * spc + i, 0)),
                pl.BlockSpec((sub, _LANE), lambda c, i: (c * spc + i, 0)),
            ],
            out_specs=pl.BlockSpec((1, _NUM_STATS, _LANE),
                                   lambda c, i: (c, 0, 0)),
            scratch_shapes=scratch,
        ),
        compiler_params=pltpu.CompilerParams(
            # Leading axis parallel -> both TensorCores on dual-TC parts (v7x);
            # trailing axis carries the shared accumulator scratch.
            dimension_semantics=("parallel", "arbitrary")),
        cost_estimate=cost,
    )(pred6, true6, mask2)
    return jnp.sum(out, axis=(0, 2))                       # (9,)


def _to_component_major(covars, n_tot, n_rows):
    """(B, L, 3, 3) -> (6, n_rows, 128), component-major (xx, yy, zz, xy, xz, yz).

    Assumes symmetric covariances (always true for covariance matrices; the
    torch MultivariateNormal KL requires it of the predictions too).  Emitted as
    a single fused slice+pad+stack copy.
    TODO(synk): have the producer emit component-major (6, N) covariances
    directly; this copy is the remaining extra HBM round trip.
    """
    flat = covars.reshape(n_tot, 9)
    comp = jnp.stack([flat[:, k] for k in _COMP_IDX], axis=0)     # (6, n_tot)
    comp = jnp.pad(comp, ((0, 0), (0, n_rows * _LANE - n_tot)))
    return comp.reshape(6, n_rows, _LANE)


# --------------------------------------------------------------------------- #
# Kernel B: joint (NxN) correlation-map masked squared error per protein      #
# --------------------------------------------------------------------------- #
def _joint_mse_kernel(pred_ref, true_ref, mrow_ref, mcol_ref, out_ref):
    """pred_ref/true_ref: (BP, TL, L) VMEM; mrow_ref: (BP, 1, L); mcol_ref:
    (BP, TL, 1); out_ref: (BP, 1, 128) per-protein accumulator (lane-dense,
    scalar broadcast over lanes; lane 0 read back by the wrapper)."""
    j = pl.program_id(1)

    @pl.when(j == 0)
    def _init():
        out_ref[...] = jnp.zeros_like(out_ref)

    d = pred_ref[...].astype(jnp.float32) - true_ref[...].astype(jnp.float32)
    m_row = mrow_ref[...].astype(jnp.float32)        # (BP, 1, L)  column mask
    m_col = mcol_ref[...].astype(jnp.float32)        # (BP, TL, 1) row mask
    # Column mask via lane broadcast, row mask via sublane broadcast: the
    # (L, L) outer-product mask is never materialized.  All operands >= 2-D.
    dm = d * m_row
    sq = dm * dm * m_col
    lane_sum = jnp.sum(sq, axis=2, keepdims=True)              # (BP, TL, 1)
    out_ref[...] += jnp.sum(lane_sum, axis=1, keepdims=True)   # (BP, 1, 1) bcast


def _joint_tiling(b, l, itemsize):
    """Pick (proteins per step, row-tile) for kernel B from a VMEM budget."""
    target = 2 * 1024 * 1024      # ~2 MiB per input per grid step
    max_blk = 6 * 1024 * 1024     # cap: 2 inputs x 2 buffers <= 24 MiB everywhere
    per_protein = l * l * itemsize
    if per_protein <= target:
        # Small proteins: fold several per grid step so each step moves >=~1 MiB.
        bp = max(1, min(b, target // max(per_protein, 1)))
        while b % bp:             # largest divisor of b not above the target
            bp -= 1
        return bp, l
    # Large proteins: tile rows; largest multiple of 8 dividing L within budget.
    row_bytes = l * itemsize
    tl_cap = max(8, min(l, max_blk // row_bytes))
    start = tl_cap - (tl_cap % 8)
    for cand in range(start, 7, -8):
        if l % cand == 0:
            return 1, cand
    return 1, l                   # fallback: full rows (vmem limit raised below)


def _run_joint_mse_kernel(pred_corrs, true_corrs, mask):
    b, l, _ = pred_corrs.shape
    itemsize = jnp.dtype(pred_corrs.dtype).itemsize
    bp, tl = _joint_tiling(b, l, itemsize)

    mask_f = mask.astype(jnp.float32)
    mask_row = mask_f.reshape(b, 1, l)
    mask_col = mask_f.reshape(b, l, 1)

    block_bytes = bp * tl * l * itemsize
    vmem_limit = int(max(32 * 1024 * 1024, 4 * block_bytes + 8 * 1024 * 1024))

    cost = pl.CostEstimate(
        flops=5 * b * l * l,
        transcendentals=0,
        bytes_accessed=2 * b * l * l * itemsize + 8 * b * l + b * _LANE * 4)

    out = pl.pallas_call(
        _joint_mse_kernel,
        out_shape=jax.ShapeDtypeStruct((b, 1, _LANE), jnp.float32),
        grid_spec=pltpu.PrefetchScalarGridSpec(
            num_scalar_prefetch=0,
            grid=(b // bp, l // tl),
            in_specs=[
                pl.BlockSpec((bp, tl, l), lambda i, j: (i, j, 0)),
                pl.BlockSpec((bp, tl, l), lambda i, j: (i, j, 0)),
                pl.BlockSpec((bp, 1, l), lambda i, j: (i, 0, 0)),
                pl.BlockSpec((bp, tl, 1), lambda i, j: (i, j, 0)),
            ],
            out_specs=pl.BlockSpec((bp, 1, _LANE), lambda i, j: (i, 0, 0)),
        ),
        compiler_params=pltpu.CompilerParams(
            # Batch axis parallel (sharded across v7x's 2 TCs); row axis carries
            # the per-protein accumulator.
            dimension_semantics=("parallel", "arbitrary"),
            vmem_limit_bytes=vmem_limit),
        cost_estimate=cost,
    )(pred_corrs, true_corrs, mask_row, mask_col)
    return out[:, 0, 0]


# --------------------------------------------------------------------------- #
# DynaProtLoss forward (wrapper around the kernels)                           #
# --------------------------------------------------------------------------- #
def dynaprot_loss(preds, batch, cfg):
    loss_weights = cfg["eval_params"]["loss_weights"]
    out_type = cfg["train_params"]["out_type"]

    mask = batch["resi_pad_mask"].astype(jnp.float32)          # (B, L)
    b, l = mask.shape
    num_res = jnp.sum(mask, axis=1)                            # (B,)

    loss_dict = {}

    # TODO(synk): the 'marginal_sqrt' branch (covars = sqrt @ sqrt, Frobenius on
    # the sqrt factors) is not implemented; only the plain 'marginal' branch is.
    if "marginal" in out_type:
        true_covars = batch["dynamics_covars_local"]           # (B, L, 3, 3)
        pred_covars = preds["marginal_covars"]                 # (B, L, 3, 3)

        n_tot = b * l
        n_rows_raw = -(-n_tot // _LANE)
        sub, n_rows = _resi_tiling(n_rows_raw)

        pred6 = _to_component_major(pred_covars, n_tot, n_rows)
        true6 = _to_component_major(true_covars, n_tot, n_rows)
        mask2 = jnp.pad(mask.reshape(n_tot), (0, n_rows * _LANE - n_tot))
        mask2 = mask2.reshape(n_rows, _LANE)

        stats = _run_resi_cov_kernel(pred6, true6, mask2, sub)
        sum_sq_err, sum_sq_true, n_valid = stats[0], stats[1], stats[2]
        kl_sum = stats[3]
        sx, sy, sxx, syy, sxy = stats[4], stats[5], stats[6], stats[7], stats[8]

        w_g = loss_weights["resi_gaussians"]
        mse_covs = sum_sq_err / (9.0 * n_valid) if w_g["mse_covs"] is not None else None
        kldiv = kl_sum / n_valid if w_g["kldiv"] is not None else None
        frob_norm = (jnp.sqrt(sum_sq_err) / jnp.sqrt(sum_sq_true)
                     if w_g["frob_norm"] is not None else None)
        # TODO(synk): log_frob_norm / affine_invariant_dist / bures_dist need a
        # 3x3 symmetric matrix log / matrix sqrt (eigendecomposition); not implemented.
        loss_dict["resi_gaussians"] = dict(
            mse_covs=mse_covs, kldiv=kldiv, frob_norm=frob_norm,
            log_frob_norm=None, affine_invariant_dist=None, bures_dist=None)

        w_r = loss_weights["resi_rmsf"]
        if w_r["corr_pcc"] is not None:
            cov_xy = n_valid * sxy - sx * sy
            var_x = n_valid * sxx - sx * sx
            var_y = n_valid * syy - sy * sy
            corr_pcc = cov_xy / jnp.sqrt(var_x * var_y)
        else:
            corr_pcc = None
        # TODO(synk): Spearman correlation needs ranking/sort; not implemented.
        loss_dict["resi_rmsf"] = dict(corr_sp=None, corr_pcc=corr_pcc)

    if "joint" in out_type:
        per_protein_sq = _run_joint_mse_kernel(
            preds["joint_covar"], batch["dynamics_correlations_nbyncovar"], mask)
        w_c = loss_weights["resi_correlations"]
        # mse_ragged: mean over proteins of per-protein MSE on the [:n_i, :n_i] block.
        mse = (jnp.mean(per_protein_sq / (num_res * num_res))
               if w_c["mse"] is not None else None)
        # TODO(synk): log_frobenius_norm_ragged needs an NxN matrix log; not implemented.
        loss_dict["resi_correlations"] = dict(log_frob_norm=None, mse=mse)

    total_loss = jnp.float32(0.0)
    for dynamics_type, d in loss_dict.items():
        for loss_name, loss in d.items():
            if loss is None:
                continue
            weight = loss_weights[dynamics_type][loss_name]
            total_loss = total_loss + weight * loss
    return total_loss, loss_dict


# --------------------------------------------------------------------------- #
# Pure-JAX reference (same math, no Pallas) for a correctness check           #
# --------------------------------------------------------------------------- #
def _reference_loss(preds, batch, cfg):
    lw = cfg["eval_params"]["loss_weights"]
    mask = batch["resi_pad_mask"].astype(jnp.float32)
    mask4 = mask[..., None, None]
    tc = batch["dynamics_covars_local"].astype(jnp.float32)
    pc = preds["marginal_covars"].astype(jnp.float32)
    n = jnp.sum(mask)

    sq_err = jnp.sum(((pc - tc) ** 2) * mask4)
    sq_true = jnp.sum((tc ** 2) * mask4)
    mse_covs = sq_err / (9.0 * n)
    frob = jnp.sqrt(sq_err) / jnp.sqrt(sq_true)

    inv_t = jnp.linalg.inv(tc)
    tr_term = jnp.einsum("blij,blji->bl", inv_t, pc)
    _, ld_t = jnp.linalg.slogdet(tc)
    _, ld_p = jnp.linalg.slogdet(pc)
    kl = 0.5 * (tr_term - 3.0 + ld_t - ld_p)
    kldiv = jnp.sum(kl * mask) / n

    rmsf_t = jnp.sqrt(jnp.trace(tc, axis1=-2, axis2=-1))
    rmsf_p = jnp.sqrt(jnp.trace(pc, axis1=-2, axis2=-1))
    sx = jnp.sum(rmsf_t * mask); sy = jnp.sum(rmsf_p * mask)
    sxx = jnp.sum(rmsf_t ** 2 * mask); syy = jnp.sum(rmsf_p ** 2 * mask)
    sxy = jnp.sum(rmsf_t * rmsf_p * mask)
    corr = (n * sxy - sx * sy) / jnp.sqrt((n * sxx - sx * sx) * (n * syy - sy * sy))

    sqmask = mask[:, :, None] * mask[:, None, :]
    diff = (preds["joint_covar"].astype(jnp.float32)
            - batch["dynamics_correlations_nbyncovar"].astype(jnp.float32))
    num_res = jnp.sum(mask, axis=1)
    joint_mse = jnp.mean(jnp.sum(diff ** 2 * sqmask, axis=(1, 2)) / (num_res ** 2))

    total = (lw["resi_gaussians"]["mse_covs"] * mse_covs
             + lw["resi_gaussians"]["kldiv"] * kldiv
             + lw["resi_gaussians"]["frob_norm"] * frob
             + lw["resi_rmsf"]["corr_pcc"] * corr
             + lw["resi_correlations"]["mse"] * joint_mse)
    return total


if __name__ == "__main__":
    # Deterministic cfg (the module's "parameters" are its loss weights).
    cfg = {
        "train_params": {"out_type": ["marginal", "joint"]},
        "eval_params": {
            "loss_weights": {
                "resi_gaussians": {"mse_covs": 1.0, "kldiv": 0.1, "frob_norm": 0.5,
                                   "log_frob_norm": None, "affine_invariant_dist": None,
                                   "bures_dist": None},
                "resi_rmsf": {"corr_sp": None, "corr_pcc": -1.0},
                "resi_correlations": {"log_frob_norm": None, "mse": 1.0},
            }
        },
    }

    B, L = 2, 8
    key = jax.random.PRNGKey(0)
    k1, k2, k3, k4, k5 = jax.random.split(key, 5)

    # Pad mask: protein 0 has 6 residues, protein 1 has 8.
    resi_pad_mask = jnp.array(
        [[1, 1, 1, 1, 1, 1, 0, 0],
         [1, 1, 1, 1, 1, 1, 1, 1]], dtype=jnp.float32)

    def make_pd(k, shape_prefix):
        a = jax.random.normal(k, shape_prefix + (3, 3), dtype=jnp.float32) * 0.3
        return a @ jnp.swapaxes(a, -1, -2) + 0.2 * jnp.eye(3, dtype=jnp.float32)

    batch = {
        "resi_pad_mask": resi_pad_mask,
        "dynamics_means": jax.random.normal(k1, (B, L, 3), dtype=jnp.float32),
        "dynamics_covars_local": make_pd(k2, (B, L)),
        "dynamics_correlations_nbyncovar": jax.random.normal(k4, (B, L, L), dtype=jnp.float32) * 0.1,
    }
    preds = {
        "marginal_covars": make_pd(k3, (B, L)),
        "joint_covar": jax.random.normal(k5, (B, L, L), dtype=jnp.float32) * 0.1,
    }

    total_loss, loss_dict = dynaprot_loss(preds, batch, cfg)
    total_loss = jax.block_until_ready(total_loss)

    ref_total = jax.block_until_ready(_reference_loss(preds, batch, cfg))
    np.testing.assert_allclose(np.asarray(total_loss), np.asarray(ref_total),
                               rtol=1e-3, atol=1e-4)
    assert np.isfinite(np.asarray(total_loss))
    print("KERNEL_OK")
</pallas_src>

<mosaic_0001>
module attributes {stable_mosaic.version = 11 : i64} {
  func.func @_resi_cov_kernel(%arg0: i32, %arg1: i32, %arg2: memref<6x8x128xf32, #tpu.memory_space<vmem>>, %arg3: memref<6x8x128xf32, #tpu.memory_space<vmem>>, %arg4: memref<8x128xf32, #tpu.memory_space<vmem>>, %arg5: memref<1x9x128xf32, #tpu.memory_space<vmem>>, %arg6: memref<9x8x128xf32, #tpu.memory_space<vmem>>) attributes {dimension_semantics = [#tpu.dimension_semantics<parallel>, #tpu.dimension_semantics<arbitrary>], iteration_bounds = array<i64: 2, 1>, scalar_prefetch = 0 : i64, scratch_operands = 1 : i64, tpu.core_type = #tpu.core_type<tc>, window_params = [{transform_indices = @transform_0, window_bounds = array<i64: 6, 8, 128>}, {transform_indices = @transform_1, window_bounds = array<i64: 6, 8, 128>}, {transform_indices = @transform_2, window_bounds = array<i64: 8, 128>}, {transform_indices = @transform_3, window_bounds = array<i64: 1, 9, 128>}]} {
    %c0_i32 = arith.constant 0 : i32
    %0 = arith.cmpi eq, %arg1, %c0_i32 : i32
    %1 = arith.extui %0 : i1 to i32
    %c0_i32_0 = arith.constant 0 : i32
    %2 = arith.cmpi ne, %1, %c0_i32_0 : i32
    scf.if %2 {
      %cst_283 = arith.constant 0.000000e+00 : f32
      %337 = vector.broadcast %cst_283 : f32 to vector<9x8x128xf32>
      %c0_284 = arith.constant 0 : index
      %c0_285 = arith.constant 0 : index
      %c0_286 = arith.constant 0 : index
      %338 = vector.load %arg6[%c0_284, %c0_285, %c0_286] : memref<9x8x128xf32, #tpu.memory_space<vmem>>, vector<9x8x128xf32>
      tpu.vector_store %arg6[%c0_284, %c0_285, %c0_286], %337 {strides = array<i32>} : memref<9x8x128xf32, #tpu.memory_space<vmem>>, vector<9x8x128xf32>,
    } else {
    }
    %c0 = arith.constant 0 : index
    %c0_1 = arith.constant 0 : index
    %3 = vector.load %arg4[%c0, %c0_1] : memref<8x128xf32, #tpu.memory_space<vmem>>, vector<8x128xf32>
    %cst = arith.constant 0.000000e+00 : f32
    %4 = vector.broadcast %cst : f32 to vector<8x128xf32>
    %cst_2 = arith.constant 0.000000e+00 : f32
    %5 = vector.broadcast %cst_2 : f32 to vector<8x128xf32>
    %c0_3 = arith.constant 0 : index
    %c0_4 = arith.constant 0 : index
    %c0_5 = arith.constant 0 : index
    %6 = vector.load %arg2[%c0_3, %c0_4, %c0_5] : memref<6x8x128xf32, #tpu.memory_space<vmem>>, vector<1x8x128xf32>
    %7 = vector.shape_cast %6 : vector<1x8x128xf32> to vector<8x128xf32>
    %c0_6 = arith.constant 0 : index
    %c0_7 = arith.constant 0 : index
    %c0_8 = arith.constant 0 : index
    %8 = vector.load %arg3[%c0_6, %c0_7, %c0_8] : memref<6x8x128xf32, #tpu.memory_space<vmem>>, vector<1x8x128xf32>
    %9 = vector.shape_cast %8 : vector<1x8x128xf32> to vector<8x128xf32>
    %10 = arith.subf %7, %9 : vector<8x128xf32>
    %c0_9 = arith.constant 0 : index
    %c0_10 = arith.constant 0 : index
    %c0_11 = arith.constant 0 : index
    %11 = vector.load %arg3[%c0_9, %c0_10, %c0_11] : memref<6x8x128xf32, #tpu.memory_space<vmem>>, vector<1x8x128xf32>
    %12 = vector.shape_cast %11 : vector<1x8x128xf32> to vector<8x128xf32>
    %13 = arith.mulf %10, %10 : vector<8x128xf32>
    %14 = arith.addf %4, %13 : vector<8x128xf32>
    %15 = arith.mulf %12, %12 : vector<8x128xf32>
    %16 = arith.addf %5, %15 : vector<8x128xf32>
    %c1 = arith.constant 1 : index
    %c0_12 = arith.constant 0 : index
    %c0_13 = arith.constant 0 : index
    %17 = vector.load %arg2[%c1, %c0_12, %c0_13] : memref<6x8x128xf32, #tpu.memory_space<vmem>>, vector<1x8x128xf32>
    %18 = vector.shape_cast %17 : vector<1x8x128xf32> to vector<8x128xf32>
    %c1_14 = arith.constant 1 : index
    %c0_15 = arith.constant 0 : index
    %c0_16 = arith.constant 0 : index
    %19 = vector.load %arg3[%c1_14, %c0_15, %c0_16] : memref<6x8x128xf32, #tpu.memory_space<vmem>>, vector<1x8x128xf32>
    %20 = vector.shape_cast %19 : vector<1x8x128xf32> to vector<8x128xf32>
    %21 = arith.subf %18, %20 : vector<8x128xf32>
    %c1_17 = arith.constant 1 : index
    %c0_18 = arith.constant 0 : index
    %c0_19 = arith.constant 0 : index
    %22 = vector.load %arg3[%c1_17, %c0_18, %c0_19] : memref<6x8x128xf32, #tpu.memory_space<vmem>>, vector<1x8x128xf32>
    %23 = vector.shape_cast %22 : vector<1x8x128xf32> to vector<8x128xf32>
    %24 = arith.mulf %21, %21 : vector<8x128xf32>
    %25 = arith.addf %14, %24 : vector<8x128xf32>
    %26 = arith.mulf %23, %23 : vector<8x128xf32>
    %27 = arith.addf %16, %26 : vector<8x128xf32>
    %c2 = arith.constant 2 : index
    %c0_20 = arith.constant 0 : index
    %c0_21 = arith.constant 0 : index
    %28 = vector.load %arg2[%c2, %c0_20, %c0_21] : memref<6x8x128xf32, #tpu.memory_space<vmem>>, vector<1x8x128xf32>
    %29 = vector.shape_cast %28 : vector<1x8x128xf32> to vector<8x128xf32>
    %c2_22 = arith.constant 2 : index
    %c0_23 = arith.constant 0 : index
    %c0_24 = arith.constant 0 : index
    %30 = vector.load %arg3[%c2_22, %c0_23, %c0_24] : memref<6x8x128xf32, #tpu.memory_space<vmem>>, vector<1x8x128xf32>
    %31 = vector.shape_cast %30 : vector<1x8x128xf32> to vector<8x128xf32>
    %32 = arith.subf %29, %31 : vector<8x128xf32>
    %c2_25 = arith.constant 2 : index
    %c0_26 = arith.constant 0 : index
    %c0_27 = arith.constant 0 : index
    %33 = vector.load %arg3[%c2_25, %c0_26, %c0_27] : memref<6x8x128xf32, #tpu.memory_space<vmem>>, vector<1x8x128xf32>
    %34 = vector.shape_cast %33 : vector<1x8x128xf32> to vector<8x128xf32>
    %35 = arith.mulf %32, %32 : vector<8x128xf32>
    %36 = arith.addf %25, %35 : vector<8x128xf32>
    %37 = arith.mulf %34, %34 : vector<8x128xf32>
    %38 = arith.addf %27, %37 : vector<8x128xf32>
    %c3 = arith.constant 3 : index
    %c0_28 = arith.constant 0 : index
    %c0_29 = arith.constant 0 : index
    %39 = vector.load %arg2[%c3, %c0_28, %c0_29] : memref<6x8x128xf32, #tpu.memory_space<vmem>>, vector<1x8x128xf32>
    %40 = vector.shape_cast %39 : vector<1x8x128xf32> to vector<8x128xf32>
    %c3_30 = arith.constant 3 : index
    %c0_31 = arith.constant 0 : index
    %c0_32 = arith.constant 0 : index
    %41 = vector.load %arg3[%c3_30, %c0_31, %c0_32] : memref<6x8x128xf32, #tpu.memory_space<vmem>>, vector<1x8x128xf32>
    %42 = vector.shape_cast %41 : vector<1x8x128xf32> to vector<8x128xf32>
    %43 = arith.subf %40, %42 : vector<8x128xf32>
    %c3_33 = arith.constant 3 : index
    %c0_34 = arith.constant 0 : index
    %c0_35 = arith.constant 0 : index
    %44 = vector.load %arg3[%c3_33, %c0_34, %c0_35] : memref<6x8x128xf32, #tpu.memory_space<vmem>>, vector<1x8x128xf32>
    %45 = vector.shape_cast %44 : vector<1x8x128xf32> to vector<8x128xf32>
    %46 = arith.mulf %43, %43 : vector<8x128xf32>
    %cst_36 = arith.constant 2.000000e+00 : f32
    %47 = vector.broadcast %cst_36 : f32 to vector<8x128xf32>
    %48 = arith.mulf %47, %46 : vector<8x128xf32>
    %49 = arith.addf %36, %48 : vector<8x128xf32>
    %50 = arith.mulf %45, %45 : vector<8x128xf32>
    %cst_37 = arith.constant 2.000000e+00 : f32
    %51 = vector.broadcast %cst_37 : f32 to vector<8x128xf32>
    %52 = arith.mulf %51, %50 : vector<8x128xf32>
    %53 = arith.addf %38, %52 : vector<8x128xf32>
    %c4 = arith.constant 4 : index
    %c0_38 = arith.constant 0 : index
    %c0_39 = arith.constant 0 : index
    %54 = vector.load %arg2[%c4, %c0_38, %c0_39] : memref<6x8x128xf32, #tpu.memory_space<vmem>>, vector<1x8x128xf32>
    %55 = vector.shape_cast %54 : vector<1x8x128xf32> to vector<8x128xf32>
    %c4_40 = arith.constant 4 : index
    %c0_41 = arith.constant 0 : index
    %c0_42 = arith.constant 0 : index
    %56 = vector.load %arg3[%c4_40, %c0_41, %c0_42] : memref<6x8x128xf32, #tpu.memory_space<vmem>>, vector<1x8x128xf32>
    %57 = vector.shape_cast %56 : vector<1x8x128xf32> to vector<8x128xf32>
    %58 = arith.subf %55, %57 : vector<8x128xf32>
    %c4_43 = arith.constant 4 : index
    %c0_44 = arith.constant 0 : index
    %c0_45 = arith.constant 0 : index
    %59 = vector.load %arg3[%c4_43, %c0_44, %c0_45] : memref<6x8x128xf32, #tpu.memory_space<vmem>>, vector<1x8x128xf32>
    %60 = vector.shape_cast %59 : vector<1x8x128xf32> to vector<8x128xf32>
    %61 = arith.mulf %58, %58 : vector<8x128xf32>
    %cst_46 = arith.constant 2.000000e+00 : f32
    %62 = vector.broadcast %cst_46 : f32 to vector<8x128xf32>
    %63 = arith.mulf %62, %61 : vector<8x128xf32>
    %64 = arith.addf %49, %63 : vector<8x128xf32>
    %65 = arith.mulf %60, %60 : vector<8x128xf32>
    %cst_47 = arith.constant 2.000000e+00 : f32
    %66 = vector.broadcast %cst_47 : f32 to vector<8x128xf32>
    %67 = arith.mulf %66, %65 : vector<8x128xf32>
    %68 = arith.addf %53, %67 : vector<8x128xf32>
    %c5 = arith.constant 5 : index
    %c0_48 = arith.constant 0 : index
    %c0_49 = arith.constant 0 : index
    %69 = vector.load %arg2[%c5, %c0_48, %c0_49] : memref<6x8x128xf32, #tpu.memory_space<vmem>>, vector<1x8x128xf32>
    %70 = vector.shape_cast %69 : vector<1x8x128xf32> to vector<8x128xf32>
    %c5_50 = arith.constant 5 : index
    %c0_51 = arith.constant 0 : index
    %c0_52 = arith.constant 0 : index
    %71 = vector.load %arg3[%c5_50, %c0_51, %c0_52] : memref<6x8x128xf32, #tpu.memory_space<vmem>>, vector<1x8x128xf32>
    %72 = vector.shape_cast %71 : vector<1x8x128xf32> to vector<8x128xf32>
    %73 = arith.subf %70, %72 : vector<8x128xf32>
    %c5_53 = arith.constant 5 : index
    %c0_54 = arith.constant 0 : index
    %c0_55 = arith.constant 0 : index
    %74 = vector.load %arg3[%c5_53, %c0_54, %c0_55] : memref<6x8x128xf32, #tpu.memory_space<vmem>>, vector<1x8x128xf32>
    %75 = vector.shape_cast %74 : vector<1x8x128xf32> to vector<8x128xf32>
    %76 = arith.mulf %73, %73 : vector<8x128xf32>
    %cst_56 = arith.constant 2.000000e+00 : f32
    %77 = vector.broadcast %cst_56 : f32 to vector<8x128xf32>
    %78 = arith.mulf %77, %76 : vector<8x128xf32>
    %79 = arith.addf %64, %78 : vector<8x128xf32>
    %80 = arith.mulf %75, %75 : vector<8x128xf32>
    %cst_57 = arith.constant 2.000000e+00 : f32
    %81 = vector.broadcast %cst_57 : f32 to vector<8x128xf32>
    %82 = arith.mulf %81, %80 : vector<8x128xf32>
    %83 = arith.addf %68, %82 : vector<8x128xf32>
    %c1_58 = arith.constant 1 : index
    %c0_59 = arith.constant 0 : index
    %c0_60 = arith.constant 0 : index
    %84 = vector.load %arg3[%c1_58, %c0_59, %c0_60] : memref<6x8x128xf32, #tpu.memory_space<vmem>>, vector<1x8x128xf32>
    %85 = vector.shape_cast %84 : vector<1x8x128xf32> to vector<8x128xf32>
    %c2_61 = arith.constant 2 : index
    %c0_62 = arith.constant 0 : index
    %c0_63 = arith.constant 0 : index
    %86 = vector.load %arg3[%c2_61, %c0_62, %c0_63] : memref<6x8x128xf32, #tpu.memory_space<vmem>>, vector<1x8x128xf32>
    %87 = vector.shape_cast %86 : vector<1x8x128xf32> to vector<8x128xf32>
    %88 = arith.mulf %85, %87 : vector<8x128xf32>
    %c5_64 = arith.constant 5 : index
    %c0_65 = arith.constant 0 : index
    %c0_66 = arith.constant 0 : index
    %89 = vector.load %arg3[%c5_64, %c0_65, %c0_66] : memref<6x8x128xf32, #tpu.memory_space<vmem>>, vector<1x8x128xf32>
    %90 = vector.shape_cast %89 : vector<1x8x128xf32> to vector<8x128xf32>
    %c5_67 = arith.constant 5 : index
    %c0_68 = arith.constant 0 : index
    %c0_69 = arith.constant 0 : index
    %91 = vector.load %arg3[%c5_67, %c0_68, %c0_69] : memref<6x8x128xf32, #tpu.memory_space<vmem>>, vector<1x8x128xf32>
    %92 = vector.shape_cast %91 : vector<1x8x128xf32> to vector<8x128xf32>
    %93 = arith.mulf %90, %92 : vector<8x128xf32>
    %94 = arith.subf %88, %93 : vector<8x128xf32>
    %c0_70 = arith.constant 0 : index
    %c0_71 = arith.constant 0 : index
    %c0_72 = arith.constant 0 : index
    %95 = vector.load %arg3[%c0_70, %c0_71, %c0_72] : memref<6x8x128xf32, #tpu.memory_space<vmem>>, vector<1x8x128xf32>
    %96 = vector.shape_cast %95 : vector<1x8x128xf32> to vector<8x128xf32>
    %c2_73 = arith.constant 2 : index
    %c0_74 = arith.constant 0 : index
    %c0_75 = arith.constant 0 : index
    %97 = vector.load %arg3[%c2_73, %c0_74, %c0_75] : memref<6x8x128xf32, #tpu.memory_space<vmem>>, vector<1x8x128xf32>
    %98 = vector.shape_cast %97 : vector<1x8x128xf32> to vector<8x128xf32>
    %99 = arith.mulf %96, %98 : vector<8x128xf32>
    %c4_76 = arith.constant 4 : index
    %c0_77 = arith.constant 0 : index
    %c0_78 = arith.constant 0 : index
    %100 = vector.load %arg3[%c4_76, %c0_77, %c0_78] : memref<6x8x128xf32, #tpu.memory_space<vmem>>, vector<1x8x128xf32>
    %101 = vector.shape_cast %100 : vector<1x8x128xf32> to vector<8x128xf32>
    %c4_79 = arith.constant 4 : index
    %c0_80 = arith.constant 0 : index
    %c0_81 = arith.constant 0 : index
    %102 = vector.load %arg3[%c4_79, %c0_80, %c0_81] : memref<6x8x128xf32, #tpu.memory_space<vmem>>, vector<1x8x128xf32>
    %103 = vector.shape_cast %102 : vector<1x8x128xf32> to vector<8x128xf32>
    %104 = arith.mulf %101, %103 : vector<8x128xf32>
    %105 = arith.subf %99, %104 : vector<8x128xf32>
    %c0_82 = arith.constant 0 : index
    %c0_83 = arith.constant 0 : index
    %c0_84 = arith.constant 0 : index
    %106 = vector.load %arg3[%c0_82, %c0_83, %c0_84] : memref<6x8x128xf32, #tpu.memory_space<vmem>>, vector<1x8x128xf32>
    %107 = vector.shape_cast %106 : vector<1x8x128xf32> to vector<8x128xf32>
    %c1_85 = arith.constant 1 : index
    %c0_86 = arith.constant 0 : index
    %c0_87 = arith.constant 0 : index
    %108 = vector.load %arg3[%c1_85, %c0_86, %c0_87] : memref<6x8x128xf32, #tpu.memory_space<vmem>>, vector<1x8x128xf32>
    %109 = vector.shape_cast %108 : vector<1x8x128xf32> to vector<8x128xf32>
    %110 = arith.mulf %107, %109 : vector<8x128xf32>
    %c3_88 = arith.constant 3 : index
    %c0_89 = arith.constant 0 : index
    %c0_90 = arith.constant 0 : index
    %111 = vector.load %arg3[%c3_88, %c0_89, %c0_90] : memref<6x8x128xf32, #tpu.memory_space<vmem>>, vector<1x8x128xf32>
    %112 = vector.shape_cast %111 : vector<1x8x128xf32> to vector<8x128xf32>
    %c3_91 = arith.constant 3 : index
    %c0_92 = arith.constant 0 : index
    %c0_93 = arith.constant 0 : index
    %113 = vector.load %arg3[%c3_91, %c0_92, %c0_93] : memref<6x8x128xf32, #tpu.memory_space<vmem>>, vector<1x8x128xf32>
    %114 = vector.shape_cast %113 : vector<1x8x128xf32> to vector<8x128xf32>
    %115 = arith.mulf %112, %114 : vector<8x128xf32>
    %116 = arith.subf %110, %115 : vector<8x128xf32>
    %c4_94 = arith.constant 4 : index
    %c0_95 = arith.constant 0 : index
    %c0_96 = arith.constant 0 : index
    %117 = vector.load %arg3[%c4_94, %c0_95, %c0_96] : memref<6x8x128xf32, #tpu.memory_space<vmem>>, vector<1x8x128xf32>
    %118 = vector.shape_cast %117 : vector<1x8x128xf32> to vector<8x128xf32>
    %c5_97 = arith.constant 5 : index
    %c0_98 = arith.constant 0 : index
    %c0_99 = arith.constant 0 : index
    %119 = vector.load %arg3[%c5_97, %c0_98, %c0_99] : memref<6x8x128xf32, #tpu.memory_space<vmem>>, vector<1x8x128xf32>
    %120 = vector.shape_cast %119 : vector<1x8x128xf32> to vector<8x128xf32>
    %121 = arith.mulf %118, %120 : vector<8x128xf32>
    %c3_100 = arith.constant 3 : index
    %c0_101 = arith.constant 0 : index
    %c0_102 = arith.constant 0 : index
    %122 = vector.load %arg3[%c3_100, %c0_101, %c0_102] : memref<6x8x128xf32, #tpu.memory_space<vmem>>, vector<1x8x128xf32>
    %123 = vector.shape_cast %122 : vector<1x8x128xf32> to vector<8x128xf32>
    %c2_103 = arith.constant 2 : index
    %c0_104 = arith.constant 0 : index
    %c0_105 = arith.constant 0 : index
    %124 = vector.load %arg3[%c2_103, %c0_104, %c0_105] : memref<6x8x128xf32, #tpu.memory_space<vmem>>, vector<1x8x128xf32>
    %125 = vector.shape_cast %124 : vector<1x8x128xf32> to vector<8x128xf32>
    %126 = arith.mulf %123, %125 : vector<8x128xf32>
    %127 = arith.subf %121, %126 : vector<8x128xf32>
    %c3_106 = arith.constant 3 : index
    %c0_107 = arith.constant 0 : index
    %c0_108 = arith.constant 0 : index
    %128 = vector.load %arg3[%c3_106, %c0_107, %c0_108] : memref<6x8x128xf32, #tpu.memory_space<vmem>>, vector<1x8x128xf32>
    %129 = vector.shape_cast %128 : vector<1x8x128xf32> to vector<8x128xf32>
    %c5_109 = arith.constant 5 : index
    %c0_110 = arith.constant 0 : index
    %c0_111 = arith.constant 0 : index
    %130 = vector.load %arg3[%c5_109, %c0_110, %c0_111] : memref<6x8x128xf32, #tpu.memory_space<vmem>>, vector<1x8x128xf32>
    %131 = vector.shape_cast %130 : vector<1x8x128xf32> to vector<8x128xf32>
    %132 = arith.mulf %129, %131 : vector<8x128xf32>
    %c1_112 = arith.constant 1 : index
    %c0_113 = arith.constant 0 : index
    %c0_114 = arith.constant 0 : index
    %133 = vector.load %arg3[%c1_112, %c0_113, %c0_114] : memref<6x8x128xf32, #tpu.memory_space<vmem>>, vector<1x8x128xf32>
    %134 = vector.shape_cast %133 : vector<1x8x128xf32> to vector<8x128xf32>
    %c4_115 = arith.constant 4 : index
    %c0_116 = arith.constant 0 : index
    %c0_117 = arith.constant 0 : index
    %135 = vector.load %arg3[%c4_115, %c0_116, %c0_117] : memref<6x8x128xf32, #tpu.memory_space<vmem>>, vector<1x8x128xf32>
    %136 = vector.shape_cast %135 : vector<1x8x128xf32> to vector<8x128xf32>
    %137 = arith.mulf %134, %136 : vector<8x128xf32>
    %138 = arith.subf %132, %137 : vector<8x128xf32>
    %c3_118 = arith.constant 3 : index
    %c0_119 = arith.constant 0 : index
    %c0_120 = arith.constant 0 : index
    %139 = vector.load %arg3[%c3_118, %c0_119, %c0_120] : memref<6x8x128xf32, #tpu.memory_space<vmem>>, vector<1x8x128xf32>
    %140 = vector.shape_cast %139 : vector<1x8x128xf32> to vector<8x128xf32>
    %c4_121 = arith.constant 4 : index
    %c0_122 = arith.constant 0 : index
    %c0_123 = arith.constant 0 : index
    %141 = vector.load %arg3[%c4_121, %c0_122, %c0_123] : memref<6x8x128xf32, #tpu.memory_space<vmem>>, vector<1x8x128xf32>
    %142 = vector.shape_cast %141 : vector<1x8x128xf32> to vector<8x128xf32>
    %143 = arith.mulf %140, %142 : vector<8x128xf32>
    %c0_124 = arith.constant 0 : index
    %c0_125 = arith.constant 0 : index
    %c0_126 = arith.constant 0 : index
    %144 = vector.load %arg3[%c0_124, %c0_125, %c0_126] : memref<6x8x128xf32, #tpu.memory_space<vmem>>, vector<1x8x128xf32>
    %145 = vector.shape_cast %144 : vector<1x8x128xf32> to vector<8x128xf32>
    %c5_127 = arith.constant 5 : index
    %c0_128 = arith.constant 0 : index
    %c0_129 = arith.constant 0 : index
    %146 = vector.load %arg3[%c5_127, %c0_128, %c0_129] : memref<6x8x128xf32, #tpu.memory_space<vmem>>, vector<1x8x128xf32>
    %147 = vector.shape_cast %146 : vector<1x8x128xf32> to vector<8x128xf32>
    %148 = arith.mulf %145, %147 : vector<8x128xf32>
    %149 = arith.subf %143, %148 : vector<8x128xf32>
    %c0_130 = arith.constant 0 : index
    %c0_131 = arith.constant 0 : index
    %c0_132 = arith.constant 0 : index
    %150 = vector.load %arg3[%c0_130, %c0_131, %c0_132] : memref<6x8x128xf32, #tpu.memory_space<vmem>>, vector<1x8x128xf32>
    %151 = vector.shape_cast %150 : vector<1x8x128xf32> to vector<8x128xf32>
    %152 = arith.mulf %151, %94 : vector<8x128xf32>
    %c3_133 = arith.constant 3 : index
    %c0_134 = arith.constant 0 : index
    %c0_135 = arith.constant 0 : index
    %153 = vector.load %arg3[%c3_133, %c0_134, %c0_135] : memref<6x8x128xf32, #tpu.memory_space<vmem>>, vector<1x8x128xf32>
    %154 = vector.shape_cast %153 : vector<1x8x128xf32> to vector<8x128xf32>
    %155 = arith.mulf %154, %127 : vector<8x128xf32>
    %156 = arith.addf %152, %155 : vector<8x128xf32>
    %c4_136 = arith.constant 4 : index
    %c0_137 = arith.constant 0 : index
    %c0_138 = arith.constant 0 : index
    %157 = vector.load %arg3[%c4_136, %c0_137, %c0_138] : memref<6x8x128xf32, #tpu.memory_space<vmem>>, vector<1x8x128xf32>
    %158 = vector.shape_cast %157 : vector<1x8x128xf32> to vector<8x128xf32>
    %159 = arith.mulf %158, %138 : vector<8x128xf32>
    %160 = arith.addf %156, %159 : vector<8x128xf32>
    %c0_139 = arith.constant 0 : index
    %c0_140 = arith.constant 0 : index
    %c0_141 = arith.constant 0 : index
    %161 = vector.load %arg2[%c0_139, %c0_140, %c0_141] : memref<6x8x128xf32, #tpu.memory_space<vmem>>, vector<1x8x128xf32>
    %162 = vector.shape_cast %161 : vector<1x8x128xf32> to vector<8x128xf32>
    %163 = arith.mulf %94, %162 : vector<8x128xf32>
    %c1_142 = arith.constant 1 : index
    %c0_143 = arith.constant 0 : index
    %c0_144 = arith.constant 0 : index
    %164 = vector.load %arg2[%c1_142, %c0_143, %c0_144] : memref<6x8x128xf32, #tpu.memory_space<vmem>>, vector<1x8x128xf32>
    %165 = vector.shape_cast %164 : vector<1x8x128xf32> to vector<8x128xf32>
    %166 = arith.mulf %105, %165 : vector<8x128xf32>
    %167 = arith.addf %163, %166 : vector<8x128xf32>
    %c2_145 = arith.constant 2 : index
    %c0_146 = arith.constant 0 : index
    %c0_147 = arith.constant 0 : index
    %168 = vector.load %arg2[%c2_145, %c0_146, %c0_147] : memref<6x8x128xf32, #tpu.memory_space<vmem>>, vector<1x8x128xf32>
    %169 = vector.shape_cast %168 : vector<1x8x128xf32> to vector<8x128xf32>
    %170 = arith.mulf %116, %169 : vector<8x128xf32>
    %171 = arith.addf %167, %170 : vector<8x128xf32>
    %c3_148 = arith.constant 3 : index
    %c0_149 = arith.constant 0 : index
    %c0_150 = arith.constant 0 : index
    %172 = vector.load %arg2[%c3_148, %c0_149, %c0_150] : memref<6x8x128xf32, #tpu.memory_space<vmem>>, vector<1x8x128xf32>
    %173 = vector.shape_cast %172 : vector<1x8x128xf32> to vector<8x128xf32>
    %174 = arith.mulf %127, %173 : vector<8x128xf32>
    %c4_151 = arith.constant 4 : index
    %c0_152 = arith.constant 0 : index
    %c0_153 = arith.constant 0 : index
    %175 = vector.load %arg2[%c4_151, %c0_152, %c0_153] : memref<6x8x128xf32, #tpu.memory_space<vmem>>, vector<1x8x128xf32>
    %176 = vector.shape_cast %175 : vector<1x8x128xf32> to vector<8x128xf32>
    %177 = arith.mulf %138, %176 : vector<8x128xf32>
    %178 = arith.addf %174, %177 : vector<8x128xf32>
    %c5_154 = arith.constant 5 : index
    %c0_155 = arith.constant 0 : index
    %c0_156 = arith.constant 0 : index
    %179 = vector.load %arg2[%c5_154, %c0_155, %c0_156] : memref<6x8x128xf32, #tpu.memory_space<vmem>>, vector<1x8x128xf32>
    %180 = vector.shape_cast %179 : vector<1x8x128xf32> to vector<8x128xf32>
    %181 = arith.mulf %149, %180 : vector<8x128xf32>
    %182 = arith.addf %178, %181 : vector<8x128xf32>
    %cst_157 = arith.constant 2.000000e+00 : f32
    %183 = vector.broadcast %cst_157 : f32 to vector<8x128xf32>
    %184 = arith.mulf %183, %182 : vector<8x128xf32>
    %185 = arith.addf %171, %184 : vector<8x128xf32>
    %c0_158 = arith.constant 0 : index
    %c0_159 = arith.constant 0 : index
    %c0_160 = arith.constant 0 : index
    %186 = vector.load %arg2[%c0_158, %c0_159, %c0_160] : memref<6x8x128xf32, #tpu.memory_space<vmem>>, vector<1x8x128xf32>
    %187 = vector.shape_cast %186 : vector<1x8x128xf32> to vector<8x128xf32>
    %c1_161 = arith.constant 1 : index
    %c0_162 = arith.constant 0 : index
    %c0_163 = arith.constant 0 : index
    %188 = vector.load %arg2[%c1_161, %c0_162, %c0_163] : memref<6x8x128xf32, #tpu.memory_space<vmem>>, vector<1x8x128xf32>
    %189 = vector.shape_cast %188 : vector<1x8x128xf32> to vector<8x128xf32>
    %c2_164 = arith.constant 2 : index
    %c0_165 = arith.constant 0 : index
    %c0_166 = arith.constant 0 : index
    %190 = vector.load %arg2[%c2_164, %c0_165, %c0_166] : memref<6x8x128xf32, #tpu.memory_space<vmem>>, vector<1x8x128xf32>
    %191 = vector.shape_cast %190 : vector<1x8x128xf32> to vector<8x128xf32>
    %192 = arith.mulf %189, %191 : vector<8x128xf32>
    %c5_167 = arith.constant 5 : index
    %c0_168 = arith.constant 0 : index
    %c0_169 = arith.constant 0 : index
    %193 = vector.load %arg2[%c5_167, %c0_168, %c0_169] : memref<6x8x128xf32, #tpu.memory_space<vmem>>, vector<1x8x128xf32>
    %194 = vector.shape_cast %193 : vector<1x8x128xf32> to vector<8x128xf32>
    %c5_170 = arith.constant 5 : index
    %c0_171 = arith.constant 0 : index
    %c0_172 = arith.constant 0 : index
    %195 = vector.load %arg2[%c5_170, %c0_171, %c0_172] : memref<6x8x128xf32, #tpu.memory_space<vmem>>, vector<1x8x128xf32>
    %196 = vector.shape_cast %195 : vector<1x8x128xf32> to vector<8x128xf32>
    %197 = arith.mulf %194, %196 : vector<8x128xf32>
    %198 = arith.subf %192, %197 : vector<8x128xf32>
    %199 = arith.mulf %187, %198 : vector<8x128xf32>
    %c3_173 = arith.constant 3 : index
    %c0_174 = arith.constant 0 : index
    %c0_175 = arith.constant 0 : index
    %200 = vector.load %arg2[%c3_173, %c0_174, %c0_175] : memref<6x8x128xf32, #tpu.memory_space<vmem>>, vector<1x8x128xf32>
    %201 = vector.shape_cast %200 : vector<1x8x128xf32> to vector<8x128xf32>
    %c3_176 = arith.constant 3 : index
    %c0_177 = arith.constant 0 : index
    %c0_178 = arith.constant 0 : index
    %202 = vector.load %arg2[%c3_176, %c0_177, %c0_178] : memref<6x8x128xf32, #tpu.memory_space<vmem>>, vector<1x8x128xf32>
    %203 = vector.shape_cast %202 : vector<1x8x128xf32> to vector<8x128xf32>
    %c2_179 = arith.constant 2 : index
    %c0_180 = arith.constant 0 : index
    %c0_181 = arith.constant 0 : index
    %204 = vector.load %arg2[%c2_179, %c0_180, %c0_181] : memref<6x8x128xf32, #tpu.memory_space<vmem>>, vector<1x8x128xf32>
    %205 = vector.shape_cast %204 : vector<1x8x128xf32> to vector<8x128xf32>
    %206 = arith.mulf %203, %205 : vector<8x128xf32>
    %c4_182 = arith.constant 4 : index
    %c0_183 = arith.constant 0 : index
    %c0_184 = arith.constant 0 : index
    %207 = vector.load %arg2[%c4_182, %c0_183, %c0_184] : memref<6x8x128xf32, #tpu.memory_space<vmem>>, vector<1x8x128xf32>
    %208 = vector.shape_cast %207 : vector<1x8x128xf32> to vector<8x128xf32>
    %c5_185 = arith.constant 5 : index
    %c0_186 = arith.constant 0 : index
    %c0_187 = arith.constant 0 : index
    %209 = vector.load %arg2[%c5_185, %c0_186, %c0_187] : memref<6x8x128xf32, #tpu.memory_space<vmem>>, vector<1x8x128xf32>
    %210 = vector.shape_cast %209 : vector<1x8x128xf32> to vector<8x128xf32>
    %211 = arith.mulf %208, %210 : vector<8x128xf32>
    %212 = arith.subf %206, %211 : vector<8x128xf32>
    %213 = arith.mulf %201, %212 : vector<8x128xf32>
    %214 = arith.subf %199, %213 : vector<8x128xf32>
    %c4_188 = arith.constant 4 : index
    %c0_189 = arith.constant 0 : index
    %c0_190 = arith.constant 0 : index
    %215 = vector.load %arg2[%c4_188, %c0_189, %c0_190] : memref<6x8x128xf32, #tpu.memory_space<vmem>>, vector<1x8x128xf32>
    %216 = vector.shape_cast %215 : vector<1x8x128xf32> to vector<8x128xf32>
    %c3_191 = arith.constant 3 : index
    %c0_192 = arith.constant 0 : index
    %c0_193 = arith.constant 0 : index
    %217 = vector.load %arg2[%c3_191, %c0_192, %c0_193] : memref<6x8x128xf32, #tpu.memory_space<vmem>>, vector<1x8x128xf32>
    %218 = vector.shape_cast %217 : vector<1x8x128xf32> to vector<8x128xf32>
    %c5_194 = arith.constant 5 : index
    %c0_195 = arith.constant 0 : index
    %c0_196 = arith.constant 0 : index
    %219 = vector.load %arg2[%c5_194, %c0_195, %c0_196] : memref<6x8x128xf32, #tpu.memory_space<vmem>>, vector<1x8x128xf32>
    %220 = vector.shape_cast %219 : vector<1x8x128xf32> to vector<8x128xf32>
    %221 = arith.mulf %218, %220 : vector<8x128xf32>
    %c1_197 = arith.constant 1 : index
    %c0_198 = arith.constant 0 : index
    %c0_199 = arith.constant 0 : index
    %222 = vector.load %arg2[%c1_197, %c0_198, %c0_199] : memref<6x8x128xf32, #tpu.memory_space<vmem>>, vector<1x8x128xf32>
    %223 = vector.shape_cast %222 : vector<1x8x128xf32> to vector<8x128xf32>
    %c4_200 = arith.constant 4 : index
    %c0_201 = arith.constant 0 : index
    %c0_202 = arith.constant 0 : index
    %224 = vector.load %arg2[%c4_200, %c0_201, %c0_202] : memref<6x8x128xf32, #tpu.memory_space<vmem>>, vector<1x8x128xf32>
    %225 = vector.shape_cast %224 : vector<1x8x128xf32> to vector<8x128xf32>
    %226 = arith.mulf %223, %225 : vector<8x128xf32>
    %227 = arith.subf %221, %226 : vector<8x128xf32>
    %228 = arith.mulf %216, %227 : vector<8x128xf32>
    %229 = arith.addf %214, %228 : vector<8x128xf32>
    %cst_203 = arith.constant 0.000000e+00 : f32
    %230 = vector.broadcast %cst_203 : f32 to vector<8x128xf32>
    %231 = arith.cmpf ogt, %3, %230 : vector<8x128xf32>
    %cst_204 = arith.constant 1.000000e+00 : f32
    %232 = vector.broadcast %cst_204 : f32 to vector<8x128xf32>
    %233 = arith.select %231, %160, %232 : vector<8x128xi1>, vector<8x128xf32>
    %cst_205 = arith.constant 0.000000e+00 : f32
    %234 = vector.broadcast %cst_205 : f32 to vector<8x128xf32>
    %235 = arith.cmpf ogt, %3, %234 : vector<8x128xf32>
    %cst_206 = arith.constant 1.000000e+00 : f32
    %236 = vector.broadcast %cst_206 : f32 to vector<8x128xf32>
    %237 = arith.select %235, %229, %236 : vector<8x128xi1>, vector<8x128xf32>
    %238 = math.absf %233 : vector<8x128xf32>
    %239 = math.absf %237 : vector<8x128xf32>
    %cst_207 = arith.constant 1.000000e-30 : f32
    %240 = vector.broadcast %cst_207 : f32 to vector<8x128xf32>
    %241 = arith.maximumf %239, %240 : vector<8x128xf32>
    %242 = arith.divf %238, %241 : vector<8x128xf32>
    %243 = math.log %242 : vector<8x128xf32>
    %244 = arith.divf %185, %233 : vector<8x128xf32>
    %cst_208 = arith.constant 3.000000e+00 : f32
    %245 = vector.broadcast %cst_208 : f32 to vector<8x128xf32>
    %246 = arith.subf %244, %245 : vector<8x128xf32>
    %247 = arith.addf %246, %243 : vector<8x128xf32>
    %cst_209 = arith.constant 5.000000e-01 : f32
    %248 = vector.broadcast %cst_209 : f32 to vector<8x128xf32>
    %249 = arith.mulf %248, %247 : vector<8x128xf32>
    %c0_210 = arith.constant 0 : index
    %c0_211 = arith.constant 0 : index
    %c0_212 = arith.constant 0 : index
    %250 = vector.load %arg3[%c0_210, %c0_211, %c0_212] : memref<6x8x128xf32, #tpu.memory_space<vmem>>, vector<1x8x128xf32>
    %251 = vector.shape_cast %250 : vector<1x8x128xf32> to vector<8x128xf32>
    %c1_213 = arith.constant 1 : index
    %c0_214 = arith.constant 0 : index
    %c0_215 = arith.constant 0 : index
    %252 = vector.load %arg3[%c1_213, %c0_214, %c0_215] : memref<6x8x128xf32, #tpu.memory_space<vmem>>, vector<1x8x128xf32>
    %253 = vector.shape_cast %252 : vector<1x8x128xf32> to vector<8x128xf32>
    %254 = arith.addf %251, %253 : vector<8x128xf32>
    %c2_216 = arith.constant 2 : index
    %c0_217 = arith.constant 0 : index
    %c0_218 = arith.constant 0 : index
    %255 = vector.load %arg3[%c2_216, %c0_217, %c0_218] : memref<6x8x128xf32, #tpu.memory_space<vmem>>, vector<1x8x128xf32>
    %256 = vector.shape_cast %255 : vector<1x8x128xf32> to vector<8x128xf32>
    %257 = arith.addf %254, %256 : vector<8x128xf32>
    %cst_219 = arith.constant 0.000000e+00 : f32
    %258 = vector.broadcast %cst_219 : f32 to vector<8x128xf32>
    %259 = arith.maximumf %257, %258 : vector<8x128xf32>
    %260 = math.sqrt %259 : vector<8x128xf32>
    %c0_220 = arith.constant 0 : index
    %c0_221 = arith.constant 0 : index
    %c0_222 = arith.constant 0 : index
    %261 = vector.load %arg2[%c0_220, %c0_221, %c0_222] : memref<6x8x128xf32, #tpu.memory_space<vmem>>, vector<1x8x128xf32>
    %262 = vector.shape_cast %261 : vector<1x8x128xf32> to vector<8x128xf32>
    %c1_223 = arith.constant 1 : index
    %c0_224 = arith.constant 0 : index
    %c0_225 = arith.constant 0 : index
    %263 = vector.load %arg2[%c1_223, %c0_224, %c0_225] : memref<6x8x128xf32, #tpu.memory_space<vmem>>, vector<1x8x128xf32>
    %264 = vector.shape_cast %263 : vector<1x8x128xf32> to vector<8x128xf32>
    %265 = arith.addf %262, %264 : vector<8x128xf32>
    %c2_226 = arith.constant 2 : index
    %c0_227 = arith.constant 0 : index
    %c0_228 = arith.constant 0 : index
    %266 = vector.load %arg2[%c2_226, %c0_227, %c0_228] : memref<6x8x128xf32, #tpu.memory_space<vmem>>, vector<1x8x128xf32>
    %267 = vector.shape_cast %266 : vector<1x8x128xf32> to vector<8x128xf32>
    %268 = arith.addf %265, %267 : vector<8x128xf32>
    %cst_229 = arith.constant 0.000000e+00 : f32
    %269 = vector.broadcast %cst_229 : f32 to vector<8x128xf32>
    %270 = arith.maximumf %268, %269 : vector<8x128xf32>
    %271 = math.sqrt %270 : vector<8x128xf32>
    %272 = arith.mulf %260, %3 : vector<8x128xf32>
    %273 = arith.mulf %271, %3 : vector<8x128xf32>
    %c0_230 = arith.constant 0 : index
    %c0_231 = arith.constant 0 : index
    %c0_232 = arith.constant 0 : index
    %274 = vector.load %arg6[%c0_230, %c0_231, %c0_232] : memref<9x8x128xf32, #tpu.memory_space<vmem>>, vector<1x8x128xf32>
    %275 = vector.shape_cast %274 : vector<1x8x128xf32> to vector<8x128xf32>
    %276 = arith.mulf %79, %3 : vector<8x128xf32>
    %277 = arith.addf %275, %276 : vector<8x128xf32>
    %c0_233 = arith.constant 0 : index
    %c0_234 = arith.constant 0 : index
    %c0_235 = arith.constant 0 : index
    %278 = vector.load %arg6[%c0_233, %c0_234, %c0_235] : memref<9x8x128xf32, #tpu.memory_space<vmem>>, vector<1x8x128xf32>
    %279 = vector.shape_cast %278 : vector<1x8x128xf32> to vector<8x128xf32>
    %280 = vector.shape_cast %277 : vector<8x128xf32> to vector<1x8x128xf32>
    tpu.vector_store %arg6[%c0_233, %c0_234, %c0_235], %280 {strides = array<i32>} : memref<9x8x128xf32, #tpu.memory_space<vmem>>, vector<1x8x128xf32>,
    %c1_236 = arith.constant 1 : index
    %c0_237 = arith.constant 0 : index
    %c0_238 = arith.constant 0 : index
    %281 = vector.load %arg6[%c1_236, %c0_237, %c0_238] : memref<9x8x128xf32, #tpu.memory_space<vmem>>, vector<1x8x128xf32>
    %282 = vector.shape_cast %281 : vector<1x8x128xf32> to vector<8x128xf32>
    %283 = arith.mulf %83, %3 : vector<8x128xf32>
    %284 = arith.addf %282, %283 : vector<8x128xf32>
    %c1_239 = arith.constant 1 : index
    %c0_240 = arith.constant 0 : index
    %c0_241 = arith.constant 0 : index
    %285 = vector.load %arg6[%c1_239, %c0_240, %c0_241] : memref<9x8x128xf32, #tpu.memory_space<vmem>>, vector<1x8x128xf32>
    %286 = vector.shape_cast %285 : vector<1x8x128xf32> to vector<8x128xf32>
    %287 = vector.shape_cast %284 : vector<8x128xf32> to vector<1x8x128xf32>
    tpu.vector_store %arg6[%c1_239, %c0_240, %c0_241], %287 {strides = array<i32>} : memref<9x8x128xf32, #tpu.memory_space<vmem>>, vector<1x8x128xf32>,
    %c2_242 = arith.constant 2 : index
    %c0_243 = arith.constant 0 : index
    %c0_244 = arith.constant 0 : index
    %288 = vector.load %arg6[%c2_242, %c0_243, %c0_244] : memref<9x8x128xf32, #tpu.memory_space<vmem>>, vector<1x8x128xf32>
    %289 = vector.shape_cast %288 : vector<1x8x128xf32> to vector<8x128xf32>
    %290 = arith.addf %289, %3 : vector<8x128xf32>
    %c2_245 = arith.constant 2 : index
    %c0_246 = arith.constant 0 : index
    %c0_247 = arith.constant 0 : index
    %291 = vector.load %arg6[%c2_245, %c0_246, %c0_247] : memref<9x8x128xf32, #tpu.memory_space<vmem>>, vector<1x8x128xf32>
    %292 = vector.shape_cast %291 : vector<1x8x128xf32> to vector<8x128xf32>
    %293 = vector.shape_cast %290 : vector<8x128xf32> to vector<1x8x128xf32>
    tpu.vector_store %arg6[%c2_245, %c0_246, %c0_247], %293 {strides = array<i32>} : memref<9x8x128xf32, #tpu.memory_space<vmem>>, vector<1x8x128xf32>,
    %c3_248 = arith.constant 3 : index
    %c0_249 = arith.constant 0 : index
    %c0_250 = arith.constant 0 : index
    %294 = vector.load %arg6[%c3_248, %c0_249, %c0_250] : memref<9x8x128xf32, #tpu.memory_space<vmem>>, vector<1x8x128xf32>
    %295 = vector.shape_cast %294 : vector<1x8x128xf32> to vector<8x128xf32>
    %296 = arith.mulf %249, %3 : vector<8x128xf32>
    %297 = arith.addf %295, %296 : vector<8x128xf32>
    %c3_251 = arith.constant 3 : index
    %c0_252 = arith.constant 0 : index
    %c0_253 = arith.constant 0 : index
    %298 = vector.load %arg6[%c3_251, %c0_252, %c0_253] : memref<9x8x128xf32, #tpu.memory_space<vmem>>, vector<1x8x128xf32>
    %299 = vector.shape_cast %298 : vector<1x8x128xf32> to vector<8x128xf32>
    %300 = vector.shape_cast %297 : vector<8x128xf32> to vector<1x8x128xf32>
    tpu.vector_store %arg6[%c3_251, %c0_252, %c0_253], %300 {strides = array<i32>} : memref<9x8x128xf32, #tpu.memory_space<vmem>>, vector<1x8x128xf32>,
    %c4_254 = arith.constant 4 : index
    %c0_255 = arith.constant 0 : index
    %c0_256 = arith.constant 0 : index
    %301 = vector.load %arg6[%c4_254, %c0_255, %c0_256] : memref<9x8x128xf32, #tpu.memory_space<vmem>>, vector<1x8x128xf32>
    %302 = vector.shape_cast %301 : vector<1x8x128xf32> to vector<8x128xf32>
    %303 = arith.addf %302, %272 : vector<8x128xf32>
    %c4_257 = arith.constant 4 : index
    %c0_258 = arith.constant 0 : index
    %c0_259 = arith.constant 0 : index
    %304 = vector.load %arg6[%c4_257, %c0_258, %c0_259] : memref<9x8x128xf32, #tpu.memory_space<vmem>>, vector<1x8x128xf32>
    %305 = vector.shape_cast %304 : vector<1x8x128xf32> to vector<8x128xf32>
    %306 = vector.shape_cast %303 : vector<8x128xf32> to vector<1x8x128xf32>
    tpu.vector_store %arg6[%c4_257, %c0_258, %c0_259], %306 {strides = array<i32>} : memref<9x8x128xf32, #tpu.memory_space<vmem>>, vector<1x8x128xf32>,
    %c5_260 = arith.constant 5 : index
    %c0_261 = arith.constant 0 : index
    %c0_262 = arith.constant 0 : index
    %307 = vector.load %arg6[%c5_260, %c0_261, %c0_262] : memref<9x8x128xf32, #tpu.memory_space<vmem>>, vector<1x8x128xf32>
    %308 = vector.shape_cast %307 : vector<1x8x128xf32> to vector<8x128xf32>
    %309 = arith.addf %308, %273 : vector<8x128xf32>
    %c5_263 = arith.constant 5 : index
    %c0_264 = arith.constant 0 : index
    %c0_265 = arith.constant 0 : index
    %310 = vector.load %arg6[%c5_263, %c0_264, %c0_265] : memref<9x8x128xf32, #tpu.memory_space<vmem>>, vector<1x8x128xf32>
    %311 = vector.shape_cast %310 : vector<1x8x128xf32> to vector<8x128xf32>
    %312 = vector.shape_cast %309 : vector<8x128xf32> to vector<1x8x128xf32>
    tpu.vector_store %arg6[%c5_263, %c0_264, %c0_265], %312 {strides = array<i32>} : memref<9x8x128xf32, #tpu.memory_space<vmem>>, vector<1x8x128xf32>,
    %c6 = arith.constant 6 : index
    %c0_266 = arith.constant 0 : index
    %c0_267 = arith.constant 0 : index
    %313 = vector.load %arg6[%c6, %c0_266, %c0_267] : memref<9x8x128xf32, #tpu.memory_space<vmem>>, vector<1x8x128xf32>
    %314 = vector.shape_cast %313 : vector<1x8x128xf32> to vector<8x128xf32>
    %315 = arith.mulf %260, %272 : vector<8x128xf32>
    %316 = arith.addf %314, %315 : vector<8x128xf32>
    %c6_268 = arith.constant 6 : index
    %c0_269 = arith.constant 0 : index
    %c0_270 = arith.constant 0 : index
    %317 = vector.load %arg6[%c6_268, %c0_269, %c0_270] : memref<9x8x128xf32, #tpu.memory_space<vmem>>, vector<1x8x128xf32>
    %318 = vector.shape_cast %317 : vector<1x8x128xf32> to vector<8x128xf32>
    %319 = vector.shape_cast %316 : vector<8x128xf32> to vector<1x8x128xf32>
    tpu.vector_store %arg6[%c6_268, %c0_269, %c0_270], %319 {strides = array<i32>} : memref<9x8x128xf32, #tpu.memory_space<vmem>>, vector<1x8x128xf32>,
    %c7 = arith.constant 7 : index
    %c0_271 = arith.constant 0 : index
    %c0_272 = arith.constant 0 : index
    %320 = vector.load %arg6[%c7, %c0_271, %c0_272] : memref<9x8x128xf32, #tpu.memory_space<vmem>>, vector<1x8x128xf32>
    %321 = vector.shape_cast %320 : vector<1x8x128xf32> to vector<8x128xf32>
    %322 = arith.mulf %271, %273 : vector<8x128xf32>
    %323 = arith.addf %321, %322 : vector<8x128xf32>
    %c7_273 = arith.constant 7 : index
    %c0_274 = arith.constant 0 : index
    %c0_275 = arith.constant 0 : index
    %324 = vector.load %arg6[%c7_273, %c0_274, %c0_275] : memref<9x8x128xf32, #tpu.memory_space<vmem>>, vector<1x8x128xf32>
    %325 = vector.shape_cast %324 : vector<1x8x128xf32> to vector<8x128xf32>
    %326 = vector.shape_cast %323 : vector<8x128xf32> to vector<1x8x128xf32>
    tpu.vector_store %arg6[%c7_273, %c0_274, %c0_275], %326 {strides = array<i32>} : memref<9x8x128xf32, #tpu.memory_space<vmem>>, vector<1x8x128xf32>,
    %c8 = arith.constant 8 : index
    %c0_276 = arith.constant 0 : index
    %c0_277 = arith.constant 0 : index
    %327 = vector.load %arg6[%c8, %c0_276, %c0_277] : memref<9x8x128xf32, #tpu.memory_space<vmem>>, vector<1x8x128xf32>
    %328 = vector.shape_cast %327 : vector<1x8x128xf32> to vector<8x128xf32>
    %329 = arith.mulf %260, %273 : vector<8x128xf32>
    %330 = arith.addf %328, %329 : vector<8x128xf32>
    %c8_278 = arith.constant 8 : index
    %c0_279 = arith.constant 0 : index
    %c0_280 = arith.constant 0 : index
    %331 = vector.load %arg6[%c8_278, %c0_279, %c0_280] : memref<9x8x128xf32, #tpu.memory_space<vmem>>, vector<1x8x128xf32>
    %332 = vector.shape_cast %331 : vector<1x8x128xf32> to vector<8x128xf32>
    %333 = vector.shape_cast %330 : vector<8x128xf32> to vector<1x8x128xf32>
    tpu.vector_store %arg6[%c8_278, %c0_279, %c0_280], %333 {strides = array<i32>} : memref<9x8x128xf32, #tpu.memory_space<vmem>>, vector<1x8x128xf32>,
    %c0_i32_281 = arith.constant 0 : i32
    %334 = arith.cmpi eq, %arg1, %c0_i32_281 : i32
    %335 = arith.extui %334 : i1 to i32
    %c0_i32_282 = arith.constant 0 : i32
    %336 = arith.cmpi ne, %335, %c0_i32_282 : i32
    scf.if %336 {
      %c0_283 = arith.constant 0 : index
      %c0_284 = arith.constant 0 : index
      %c0_285 = arith.constant 0 : index
      %337 = vector.load %arg6[%c0_283, %c0_284, %c0_285] : memref<9x8x128xf32, #tpu.memory_space<vmem>>, vector<9x8x128xf32>
      %cst_286 = arith.constant dense<0.000000e+00> : vector<9x128xf32>
      %338 = vector.multi_reduction <add>, %337, %cst_286 [1] : vector<9x8x128xf32> to vector<9x128xf32>
      %c0_287 = arith.constant 0 : index
      %c0_288 = arith.constant 0 : index
      %c0_289 = arith.constant 0 : index
      %339 = vector.load %arg5[%c0_287, %c0_288, %c0_289] : memref<1x9x128xf32, #tpu.memory_space<vmem>>, vector<1x9x128xf32>
      %340 = vector.shape_cast %339 : vector<1x9x128xf32> to vector<9x128xf32>
      %341 = vector.shape_cast %338 : vector<9x128xf32> to vector<1x9x128xf32>
      tpu.vector_store %arg5[%c0_287, %c0_288, %c0_289], %341 {strides = array<i32>} : memref<1x9x128xf32, #tpu.memory_space<vmem>>, vector<1x9x128xf32>,
    } else {
    }
    return
  }
  func.func @transform_0(%arg0: i32, %arg1: i32) -> (i32, i32, i32) {
    %c1_i32 = arith.constant 1 : i32
    %0 = arith.muli %arg0, %c1_i32 : i32
    %1 = arith.addi %0, %arg1 : i32
    %c0_i32 = arith.constant 0 : i32
    %c0_i32_0 = arith.constant 0 : i32
    %c0_i32_1 = arith.constant 0 : i32
    return %c0_i32, %1, %c0_i32_0 : i32, i32, i32
  }
  func.func @transform_1(%arg0: i32, %arg1: i32) -> (i32, i32, i32) {
    %c1_i32 = arith.constant 1 : i32
    %0 = arith.muli %arg0, %c1_i32 : i32
    %1 = arith.addi %0, %arg1 : i32
    %c0_i32 = arith.constant 0 : i32
    %c0_i32_0 = arith.constant 0 : i32
    %c0_i32_1 = arith.constant 0 : i32
    return %c0_i32, %1, %c0_i32_0 : i32, i32, i32
  }
  func.func @transform_2(%arg0: i32, %arg1: i32) -> (i32, i32) {
    %c1_i32 = arith.constant 1 : i32
    %0 = arith.muli %arg0, %c1_i32 : i32
    %1 = arith.addi %0, %arg1 : i32
    %c0_i32 = arith.constant 0 : i32
    %c0_i32_0 = arith.constant 0 : i32
    return %1, %c0_i32 : i32, i32
  }
  func.func @transform_3(%arg0: i32, %arg1: i32) -> (i32, i32, i32) {
    %c0_i32 = arith.constant 0 : i32
    %c0_i32_0 = arith.constant 0 : i32
    %c0_i32_1 = arith.constant 0 : i32
    return %arg0, %c0_i32, %c0_i32_0 : i32, i32, i32
  }
}

</mosaic_0001>

<bundles_post_ra>
// kernel: tpu_custom_call.1
= control target key start
LH: loop header
LB: loop body
LE: loop exit
PB: predicated region body
PF: predicated region fallthrough
CT: control target
= control target key end

     0   :  { %s1293_s0 = inlined_call_operand.hbm [shape: f32[6,16,128], index: 0, kind: input, shape index: {}]   ;;  %s1294_s1 = inlined_call_operand.hbm [shape: f32[6,16,128], index: 1, kind: input, shape index: {}]   ;;  %s1295_s2 = inlined_call_operand.hbm [shape: f32[16,128], index: 2, kind: input, shape index: {}]   ;;  %s1296_s3 = inlined_call_operand.vmem [shape: f32[2,9,128], index: 3, kind: output, shape index: {}]  }
   0x1   :  { %1302 = sst [smem:[#allocation10_spill]] %s1293_s0 }
   0x2   :  { %8 = vsyncpa [#allocation4], 0 }
   0x3   :  { %10 = vsyncpa [#allocation4 + $0x1], 0 }
   0x4   :  { %11 = vsyncpa [#allocation6], 0 }
   0x5   :  { %13 = vsyncpa [#allocation6 + $0x1], 0  ;;  %s976_s12 = smov 0   ;;  %s978_s13 = smov 0  }
   0x6   :  { %s980_s14 = smov 0   ;;  %s982_s15 = smov 0  }
   0x7   :  { %s984_s16 = smov 0   ;;  %s986_s17 = smov 0  }
   0x8 LB: > { %s1298_s18 = sadd.s32 4294967295, %s948_s17   ;;  %s31_s19 = sadd.s32 1, %s944_s16  ;;  %s948_s17 = sphi %s986_s17, %s19_s17   ;;  %s944_s16 = sphi %s984_s16, %s1320_s16   ;;  %s940_s15 = sphi %s982_s15, %s1319_s15   ;;  %s936_s14 = sphi %s980_s14, %s1318_s14   ;;  %s932_s13 = sphi %s978_s13, %s1317_s13   ;;  %s928_s12 = sphi %s976_s12, %s1316_s12  }
   0x9   : > { %p33_p0 = scmp.ge.s32.totalorder %s31_s19, 2  ;;  %s40_s20 = sadd.s32 1, %s936_s14 }
   0xa   : > { %p47_p1 = scmp.ne.s32.totalorder %s936_s14, %s932_s13  ;;  %p48_p2 = scmp.eq.s32.totalorder %s948_s17, 0 }
   0xb   : > { %s1322_s19 = smov (%p33_p0, %s31_s19), 0  ;;  %p53_p4 = scmp.ne.s32.totalorder %s932_s13, %s928_s12 }
   0xc   : > { %p49_p3 = por %p48_p2, %p47_p1  ;;  %s37_s21 = ssub.s32 %s944_s16, %s1322_s19 }
   0xd   : > { %p54_p5 = scmp.eq.s32.totalorder %s1298_s18, 0  ;;  %p38_p6 = scmp.eq.s32.totalorder %s37_s21, 0 }
   0xe   : > { %p742_p8 = scmp.lt.s32.totalorder %s948_s17, 2  ;;  %s1026_s24 = sand.u32 1, %s936_s14  }
   0xf   : > { %p1017_p7 = por %p54_p5, %p53_p4  ;;  %s1029_s25 = sshll.u32 %s944_s16, 7 }
  0x10   : > { %s1023_s23 = scalar_select %p38_p6, %s936_s14, %s40_s20  }
  0x11   : > { %s1303_s22 = scalar_select %p1017_p7, 1, 0 }
  0x12   : > { %s723_s26 = smul.u32 48, %s1026_s24  ;;  %p1032_p9 = pnand %p742_p8, %p49_p3 }
  0x13   : > { %s180_s28 = sand.u32 1, %s948_s17   ;;  %s1041_s4 = scalar_lea.hbm %s1294_s1, %s1029_s25 }
  0x14   : > { %s1304_s27 = scalar_select %p1032_p9, 1, 0 }
  0x15   : > { %s184_s5 = scalar_lea.vmem [#allocation5], %s723_s26  ;;  %s1049_s7 = scalar_lea.sflag [#allocation6], %s180_s28 }
  0x16   : > { %s191_s6 = sshll.u32 %s184_s5, 4  ;;  %s804_s8 = scalar_lea.hbm %s1041_s4, 768  ;;  %s1046_s6 = int_to_ptr.vmem [resolvable:$true] %s191_s6 }
  0x17   : > { %p805_p12 = scmp.ne.s32.totalorder %s1041_s4, %s804_s8  ;;  %p1055_p13 = pneg %p1032_p9 }
  0x18   : > { %s809_s12 = scalar_lea.hbm %s1294_s1, 1536  ;;  %p810_p2 = scmp.lt.u32.totalorder %s1041_s4, %s1294_s1 }
  0x19   : > { %p807_p0 = pnand %p1055_p13, %p805_p12  ;;  %p811_p3 = scmp.lt.u32.totalorder %s809_s12, %s804_s8 }
  0x1a   : > { %p813_p5 = scmp.lt.u32.totalorder %s804_s8, %s1041_s4 }
  0x1b   : > { %p808_p1 = pneg %p807_p0  ;;  %p812_p4 = por %p811_p3, %p810_p2 }
  0x1d   : > { %p814_p6 = por %p813_p5, %p812_p4 }
  0x1f   : > { %p815_p8 = pnand %p814_p6, %p808_p1 }
  0x21   : > { %818 = shalt.err (!%p815_p8)
}
  0x22   : > { %s819_s28 = scalar_lea.vmem %s1046_s6, 768  ;;  %s950_s29 = smov [#allocation5]  }
  0x23   : > { %p820_p12 = scmp.ne.s32.totalorder %s1046_s6, %s819_s28  ;;  %s824_s30 = sshll.u32 %s950_s29, 4  ;;  %s825_s30 = int_to_ptr.vmem [resolvable:$false] %s824_s30 }
  0x24   : > { %s826_s5 = scalar_lea.vmem %s825_s30, 1536  ;;  %p827_p11 = scmp.lt.s32.totalorder %s1046_s6, %s825_s30 }
  0x25   : > { %p822_p0 = pnand %p820_p12, %p1055_p13  ;;  %p828_p7 = scmp.lt.s32.totalorder %s826_s5, %s819_s28 }
  0x27   : > { %p823_p10 = pneg %p822_p0  ;;  %p829_p2 = por %p828_p7, %p827_p11 }
  0x29   : > { %p830_p3 = pnand %p829_p2, %p823_p10 }
  0x2b   : > { %833 = shalt.err (!%p830_p3)
}
  0x2c   : > { %s1299_s8 = smov 256   ;;  %s1300_s10 = smov 128  }
  0x2d   : > { %s953_s11 = smov 8   ;;  %p1306_p7 = scmp.lt.s32.totalorder %s948_s17, 3 }
  0x2e   : > { %738 = dma.hbm_to_vmem [thread:$0]  (!%p1032_p9), %s1041_s4, 768, %s1046_s6, %s1049_s7, %s1299_s8, %s1300_s10, %s953_s11  }
  0x2f   : > { %p1307_p10 = scmp.ge.s32.totalorder %s948_s17, 1  ;;  %s1309_s0 = sld [smem:[#allocation10_spill]] }
  0x30   : > { %s163_s29 = scalar_lea.vmem [#allocation3], %s723_s26  ;;  %s703_s5 = sshll.u32 %s1026_s24, 3 }
  0x31   : > { %p1086_p11 = pnand %p1307_p10, %p1306_p7  ;;  %s170_s30 = sshll.u32 %s163_s29, 4  ;;  %s1099_s30 = int_to_ptr.vmem [resolvable:$true] %s170_s30 }
  0x32   : > { %s160_s4 = scalar_lea.sflag [#allocation4], %s1026_s24 }
  0x33   : > { %s1308_s12 = scalar_select %p1086_p11, 1, 0 }
  0x35   : > { %s1094_s28 = scalar_lea.hbm %s1309_s0, %s1029_s25  ;;  %s839_s21 = scalar_lea.hbm %s1309_s0, 1536 }
  0x36   : > { %s834_s6 = scalar_lea.hbm %s1094_s28, 768  ;;  %p840_p6 = scmp.lt.u32.totalorder %s1094_s28, %s1309_s0 }
  0x37   : > { %p835_p1 = scmp.ne.s32.totalorder %s1094_s28, %s834_s6  ;;  %p841_p8 = scmp.lt.u32.totalorder %s839_s21, %s834_s6 }
  0x38   : > { %p843_p0 = scmp.lt.u32.totalorder %s834_s6, %s1094_s28 }
  0x39   : > { %p837_p4 = pnand %p835_p1, %p1055_p13  ;;  %p842_p12 = por %p841_p8, %p840_p6 }
  0x3b   : > { %p838_p5 = pneg %p837_p4  ;;  %p844_p2 = por %p843_p0, %p842_p12 }
  0x3d   : > { %p845_p3 = pnand %p844_p2, %p838_p5 }
  0x3f   : > { %848 = shalt.err (!%p845_p3)
}
  0x40   : > { %s849_s26 = scalar_lea.vmem %s1099_s30, 768  ;;  %s954_s18 = smov [#allocation3]  }
  0x41   : > { %p850_p7 = scmp.ne.s32.totalorder %s1099_s30, %s849_s26  ;;  %s854_s29 = sshll.u32 %s954_s18, 4  ;;  %s855_s29 = int_to_ptr.vmem [resolvable:$false] %s854_s29 }
  0x42   : > { %s856_s8 = scalar_lea.vmem %s855_s29, 1536  ;;  %p857_p4 = scmp.lt.s32.totalorder %s1099_s30, %s855_s29 }
  0x43   : > { %p852_p10 = pnand %p850_p7, %p1055_p13  ;;  %p858_p11 = scmp.lt.s32.totalorder %s856_s8, %s849_s26 }
  0x45   : > { %p853_p1 = pneg %p852_p10  ;;  %p859_p6 = por %p858_p11, %p857_p4 }
  0x47   : > { %p860_p8 = pnand %p859_p6, %p853_p1 }
  0x49   : > { %863 = shalt.err (!%p860_p8)
}
  0x4a   : > { %s1310_s10 = smov 128   ;;  %s1311_s6 = smov 256  }
  0x4b   : > { %735 = dma.hbm_to_vmem [thread:$0]  (!%p1032_p9), %s1094_s28, 768, %s1099_s30, %s160_s4, %s1311_s6, %s1310_s10, %s953_s11  }
  0x4c   : > { %s1132_s26 = scalar_lea.hbm %s1295_s2, %s1029_s25  ;;  %s205_s18 = scalar_lea.vmem [#allocation7], %s703_s5 }
  0x4d   : > { %s213_s29 = sshll.u32 %s205_s18, 4  ;;  %s864_s8 = scalar_lea.hbm %s1132_s26, 128  ;;  %s214_s29 = int_to_ptr.vmem [resolvable:$true] %s213_s29 }
  0x4e   : > { %p865_p11 = scmp.ne.s32.totalorder %s1132_s26, %s864_s8  ;;  %s869_s28 = scalar_lea.hbm %s1295_s2, 256 }
  0x4f   : > { %p870_p0 = scmp.lt.u32.totalorder %s1132_s26, %s1295_s2  ;;  %p871_p2 = scmp.lt.u32.totalorder %s869_s28, %s864_s8 }
  0x50   : > { %p867_p5 = pnand %p865_p11, %p1055_p13  ;;  %p873_p7 = scmp.lt.u32.totalorder %s864_s8, %s1132_s26 }
  0x51   : > { %p872_p3 = por %p871_p2, %p870_p0 }
  0x52   : > { %p868_p12 = pneg %p867_p5 }
  0x53   : > { %p874_p10 = por %p873_p7, %p872_p3 }
  0x55   : > { %p875_p1 = pnand %p874_p10, %p868_p12 }
  0x57   : > { %878 = shalt.err (!%p875_p1)
}
  0x58   : > { %s879_s24 = scalar_lea.vmem %s214_s29, 128  ;;  %s955_s5 = smov [#allocation7]  }
  0x59   : > { %p880_p4 = scmp.ne.s32.totalorder %s214_s29, %s879_s24  ;;  %s884_s4 = sshll.u32 %s955_s5, 4  ;;  %s885_s4 = int_to_ptr.vmem [resolvable:$false] %s884_s4 }
  0x5a   : > { %s886_s0 = scalar_lea.vmem %s885_s4, 256  ;;  %p887_p11 = scmp.lt.s32.totalorder %s214_s29, %s885_s4 }
  0x5b   : > { %p882_p6 = pnand %p880_p4, %p1055_p13  ;;  %p888_p5 = scmp.lt.s32.totalorder %s886_s0, %s879_s24 }
  0x5d   : > { %p883_p8 = pneg %p882_p6  ;;  %p889_p9 = por %p888_p5, %p887_p11 }
  0x5f   : > { %p890_p0 = pnand %p889_p9, %p883_p8 }
  0x61   : > { %893 = shalt.err (!%p890_p0)
}
  0x62   : > { %p1312_p2 = scmp.ne.s32.totalorder %s1304_s27, 0  ;;  %p1313_p12 = scmp.ne.s32.totalorder %s1308_s12, 0 }
  0x63   : > { %s224_s9 = sand.u32 (!%p1313_p12), 1, %s932_s13   ;;  %p1314_p13 = scmp.ne.s32.totalorder (!%p1313_p12), %s1303_s22, 0 }
  0x64   : > { %741 = dma.hbm_to_vmem [thread:$0]  (!%p1312_p2), %s1132_s26, 128, %s214_s29, %s1049_s7  }
  0x65   : > { %222 = sbr.rel (%p1313_p12) target bundleno = 186 (0xba), region = 32  ;;  %s225_s6 = scalar_lea.sflag (!%p1313_p12), [#allocation4], %s224_s9 }
  0x66   : > { %s725_s10 = smul.u32 (!%p1313_p12), 48, %s224_s9 }
  0x68   : > { %s1157_s20 = scalar_lea.vmem (!%p1313_p12), [#allocation3], %s725_s10 }
  0x6c   : > { %919 = dma.done.wait (%p1314_p13), %s225_s6, 768  }
  0x6d   : > { %921 = vsyncadd (%p1314_p13), %s225_s6, 4294966528  ;;  %s1315_s27 = sadd.s32 4294967295, %s948_s17   ;;  %s237_s26 = scalar_lea.vmem [#allocation5], %s725_s10 }
  0x6e   : > { %s233_s21 = sand.u32 1, %s1315_s27  }
  0x6f   : > { %s234_s7 = scalar_lea.sflag [#allocation6], %s233_s21 }
  0x70   : > { %923 = dma.done.wait (%p1314_p13), %s234_s7, 896  }
  0x71   : > { %925 = vsyncadd (%p1314_p13), %s234_s7, 4294966400  ;;  %s706_s12 = sshll.u32 %s224_s9, 3  ;;  %v1170_v0 = vld [vmem:[%s1157_s20] sm:$0xff]  ;;  %v1175_v2 = vld [vmem:[%s1157_s20 + $0x8] sm:$0xff]  ;;  %p282_p9 = scmp.lt.s32.totalorder %s940_s15, 1  ;;  %vm558_vm5 = vcmask 1041409  }
  0x72   : > { %v1172_v1 = vld [vmem:[%s237_s26] sm:$0xff]  ;;  %v1177_v3 = vld [vmem:[%s237_s26 + $0x8] sm:$0xff]  ;;  %v1184_v6 = vld [vmem:[%s1157_s20 + $0x10] sm:$0xff]  ;;  %s246_s22 = scalar_lea.vmem [#allocation7], %s706_s12  ;;  %v430_v46 = vadd.f32 %v1175_v2, %v1170_v0  ;;  %vm560_vm6 = vcmask 1042434   ;;  %vm562_vm7 = vcmask 1043459  }
  0x73   : > { %v303_v4 = vsub.f32 %v1170_v0, %v1172_v1  ;;  %v312_v5 = vsub.f32 %v1175_v2, %v1177_v3  ;;  %v306_v7 = vmul.f32 %v1172_v1, %v1172_v1  ;;  %v315_v8 = vmul.f32 %v1177_v3, %v1177_v3  ;;  %v712_v9 = vld [vmem:[%s237_s26 + $0x10] sm:$0xff]  ;;  %v1191_v10 = vld [vmem:[%s1157_s20 + $0x18] sm:$0xff]  ;;  %v718_v14 = vld [vmem:[%s237_s26 + $0x28] sm:$0xff]  ;;  %s1324_s15 = smov (!%p282_p9, %s940_s15), 1 }
  0x74   : > { %v714_v11 = vld [vmem:[%s237_s26 + $0x18] sm:$0xff]  ;;  %v321_v12 = vsub.f32 %v1184_v6, %v712_v9  ;;  %v324_v18 = vmul.f32 %v712_v9, %v712_v9  ;;  %v716_v19 = vld [vmem:[%s237_s26 + $0x20] sm:$0xff]  ;;  %v1198_v20 = vld [vmem:[%s1157_s20 + $0x28] sm:$0xff]  ;;  %v391_v21 = vmul.f32 %v1184_v6, %v1175_v2  ;;  %v356_v25 = vmul.f32 %v718_v14, %v718_v14  ;;  %s722_s18 = sshll.u32 %s1324_s15, 4 }
  0x75   : > { %v330_v13 = vsub.f32 %v1191_v10, %v714_v11  ;;  %v1195_v15 = vld [vmem:[%s246_s22] sm:$0xff]  ;;  %v304_v16 = vmul.f32 %v303_v4, %v303_v4  ;;  %v313_v17 = vmul.f32 %v312_v5, %v312_v5  ;;  %v316_v22 = vadd.f32 %v315_v8, %v306_v7  ;;  %s1269_s11 = scalar_lea.vmem %s1296_s3, %s722_s18 }
  0x76   : > { %v1202_v23 = vmul.f32 %v714_v11, %v714_v11  ;;  %v1205_v24 = vld [vmem:[%s1157_s20 + $0x20] sm:$0xff]  ;;  %v359_v26 = vmul.f32 %v712_v9, %v1177_v3  ;;  %v322_v27 = vmul.f32 %v321_v12, %v321_v12  ;;  %v1209_v30 = vmul.f32 %v716_v19, %v716_v19 }
  0x77   : > { %v331_v28 = vmul.f32 %v330_v13, %v330_v13  ;;  %v341_v29 = vsub.f32 %v1205_v24, %v716_v19  ;;  %v365_v31 = vmul.f32 %v718_v14, %v716_v19  ;;  %v366_v32 = vmul.f32 %v714_v11, %v712_v9 }
  0x78   : > { %v392_v33 = vmul.f32 %v1198_v20, %v1198_v20  ;;  %v395_v34 = vmul.f32 %v1191_v10, %v1184_v6  ;;  %vm405_vm0 = vcmp.gt.f32.partialorder %v1195_v15, 0.0  ;;  %v314_v35 = vadd.f32 %v313_v17, %v304_v16 }
  0x79   : > { %v352_v36 = vsub.f32 %v1198_v20, %v718_v14  ;;  %v396_v37 = vmul.f32 %v1198_v20, %v1205_v24  ;;  %v400_v38 = vmul.f32 %v1198_v20, %v1191_v10  ;;  %v360_v39 = vsub.f32 %v359_v26, %v356_v25 }
  0x7a   : > { %v393_v40 = vsub.f32 %v391_v21, %v392_v33  ;;  %v401_v41 = vmul.f32 %v1205_v24, %v1175_v2  ;;  %v420_v42 = vadd.f32 %v1177_v3, %v1172_v1  ;;  %v368_v43 = vmul.f32 %v718_v14, %v714_v11 }
  0x7b   : > { %v369_v44 = vmul.f32 %v716_v19, %v1177_v3  ;;  %v397_v45 = vsub.f32 %v395_v34, %v396_v37  ;;  %v367_v47 = vsub.f32 %v365_v31, %v366_v32  ;;  %v325_v51 = vadd.f32 %v324_v18, %v316_v22 }
  0x7c   : > { %v394_v48 = vmul.f32 %v393_v40, %v1170_v0  ;;  %v402_v49 = vsub.f32 %v400_v38, %v401_v41  ;;  %v421_v50 = vadd.f32 %v712_v9, %v420_v42  ;;  %v335_v52 = vmul.f32 2.0, %v1202_v23 }
  0x7d   : > { %v398_v53 = vmul.f32 %v1191_v10, %v397_v45  ;;  %v431_v54 = vadd.f32 %v1184_v6, %v430_v46  ;;  %v332_v55 = vmul.f32 2.0, %v331_v28  ;;  %v342_v56 = vmul.f32 %v341_v29, %v341_v29 }
  0x7e   : > { %v403_v57 = vmul.f32 %v1205_v24, %v402_v49  ;;  %v1233_v58 = vmax.f32 %v421_v50, 0.0  ;;  %v323_v59 = vadd.f32 %v322_v27, %v314_v35  ;;  %v346_v60 = vmul.f32 2.0, %v1209_v30 }
  0x7f   : > { %v399_v61 = vsub.f32 %v394_v48, %v398_v53  ;;  %v432_v62 = vmax.f32 %v431_v54, 0.0  ;;  %v370_v63 = vsub.f32 %v368_v43, %v369_v44  ;;  %v374_v4 = vmul.f32 %v360_v39, %v1172_v1 }
  0x80   : > { %v375_v5 = vmul.f32 %v714_v11, %v367_v47  ;;  %794 = vrsqrt.f32 %v1233_v58  ;;  %v336_v7 = vadd.f32 %v335_v52, %v325_v51  ;;  %v361_v8 = vmul.f32 %v712_v9, %v1172_v1 }
  0x81   : > { %v404_v12 = vadd.f32 %v403_v57, %v399_v61  ;;  %796 = vrsqrt.f32 %v432_v62  ;;  %v371_v13 = vmul.f32 %v716_v19, %v714_v11  ;;  %v372_v16 = vmul.f32 %v718_v14, %v1172_v1 }
  0x82   : > { %v343_v17 = vmul.f32 2.0, %v342_v56  ;;  %v353_v18 = vmul.f32 %v352_v36, %v352_v36  ;;  %v333_v22 = vadd.f32 %v332_v55, %v323_v59  ;;  %v376_v26 = vadd.f32 %v375_v5, %v374_v4 }
  0x83   : > { %v407_v21 = vsel %vm405_vm0, %v404_v12, 1.0  ;;  %v377_v27 = vmul.f32 %v716_v19, %v370_v63  ;;  %v347_v29 = vadd.f32 %v346_v60, %v336_v7  ;;  %v357_v31 = vmul.f32 2.0, %v356_v25 }
  0x84   : > { %v409_v28 = vand.u32 2147483647, %v407_v21  ;;  %v362_v32 = vsub.f32 %v361_v8, %v1209_v30  ;;  %v363_v9 = vmul.f32 %v1177_v3, %v1172_v1  ;;  %v373_v33 = vsub.f32 %v371_v13, %v372_v16 }
  0x85   : > { %v384_v11 = vmul.f32 %v1191_v10, %v367_v47  ;;  %v385_v14 = vmul.f32 %v1205_v24, %v370_v63  ;;  %v344_v35 = vadd.f32 %v343_v17, %v333_v22  ;;  %v354_v36 = vmul.f32 2.0, %v353_v18 }
  0x86   : > { %v410_v34 = vmax.f32 %v409_v28, 1e-30  ;;  %v378_v37 = vadd.f32 %v377_v27, %v376_v26  ;;  %v364_v19 = vsub.f32 %v363_v9, %v1202_v23  ;;  %v379_v38 = vmul.f32 %v360_v39, %v1170_v0 }
  0x87   : > { %v380_v25 = vmul.f32 %v1175_v2, %v362_v32  ;;  %v358_v40 = vadd.f32 %v357_v31, %v347_v29  ;;  %v386_v41 = vadd.f32 %v385_v14, %v384_v11  ;;  %v387_v1 = vmul.f32 %v1198_v20, %v373_v33 }
  0x88   : > { %798 = vrcp.f32 %v410_v34  ;;  %vm425_vm1 = vcmp.eq.f32.partialorder %v1233_v58, inf  ;;  %vm435_vm2 = vcmp.eq.f32.partialorder %v432_v62, inf  ;;  %v438_v24 = vand.u32 2147483648, %v432_v62 }
  0x89   : > { %v355_v42 = vadd.f32 %v354_v36, %v344_v35  ;;  %v406_v23 = vsel %vm405_vm0, %v378_v37, 1.0  ;;  %vm437_vm3 = vcmp.eq.f32.partialorder %v432_v62, 0.0  ;;  %v381_v0 = vadd.f32 %v380_v25, %v379_v38 }
  0x8a   : > { %v795_v30 = vpop.eup %794  ;;  %v382_v2 = vmul.f32 %v1184_v6, %v364_v19  ;;  %800 = vrcp.f32 %v406_v23  ;;  %v428_v20 = vand.u32 2147483648, %v1233_v58  ;;  %v388_v39 = vadd.f32 %v387_v1, %v386_v41 }
  0x8b   : > { %v797_v3 = vpop.eup %796  ;;  %v424_v10 = vmul.f32 %v795_v30, %v1233_v58  ;;  %vm427_vm4 = vcmp.eq.f32.partialorder %v1233_v58, 0.0  ;;  %v408_v46 = vand.u32 2147483647, %v406_v23  ;;  %v443_v50 = vmul.f32 %v355_v42, %v1195_v15 }
  0x8c   : > { %v434_v43 = vmul.f32 %v797_v3, %v432_v62  ;;  %v383_v6 = vadd.f32 %v382_v2, %v381_v0  ;;  %v389_v52 = vmul.f32 2.0, %v388_v39  ;;  %v448_v53 = vmul.f32 %v358_v40, %v1195_v15 }
  0x8d   : > { %v426_v44 = vsel %vm425_vm1, %v1233_v58, %v424_v10  ;;  %v495_v57 = vrot.slane %v443_v50, 4  ;;  %v507_v5 = vrot.slane %v1195_v15, 4  ;;  %vm564_vm8 = vcmask 1044484  }
  0x8e   : > { %v436_v45 = vsel %vm435_vm2, %v432_v62, %v434_v43  ;;  %v429_v49 = vsel %vm427_vm4, %v428_v20, %v426_v44  ;;  %v390_v58 = vadd.f32 %v389_v52, %v383_v6  ;;  %v501_v59 = vrot.slane %v448_v53, 4 }
  0x8f   : > { %v439_v47 = vsel %vm437_vm3, %v438_v24, %v436_v45  ;;  %v440_v62 = vmul.f32 %v429_v49, %v1195_v15  ;;  %v496_v4 = vadd.f32 %v495_v57, %v443_v50  ;;  %v508_v21 = vadd.f32 %v507_v5, %v1195_v15 }
  0x90   : > { %v441_v48 = vmul.f32 %v439_v47, %v1195_v15  ;;  %v502_v8 = vadd.f32 %v501_v59, %v448_v53  ;;  %vm566_vm9 = vcmask 1045509   ;;  %vm568_vm10 = vcmask 1046534  }
  0x91   : > { %v470_v13 = vmul.f32 %v440_v62, %v429_v49  ;;  %v497_v18 = vrot.slane %v496_v4, 2  ;;  %v519_v22 = vrot.slane %v440_v62, 4  ;;  %v509_v11 = vrot.slane %v508_v21, 2 }
  0x92   : > { %v799_v51 = vpop.eup %798  ;;  %v480_v54 = vmul.f32 %v441_v48, %v429_v49  ;;  %v475_v16 = vmul.f32 %v441_v48, %v439_v47  ;;  %v503_v27 = vrot.slane %v502_v8, 2  ;;  %v525_v28 = vrot.slane %v441_v48, 4 }
  0x93   : > { %v412_v55 = vmul.f32 %v799_v51, %v408_v46  ;;  %v531_v32 = vrot.slane %v470_v13, 4  ;;  %v520_v14 = vadd.f32 %v519_v22, %v440_v62  ;;  %v498_v35 = vadd.f32 %v497_v18, %v496_v4 }
  0x94   : > { %v543_v56 = vrot.slane %v480_v54, 4  ;;  %v801_v61 = vpop.eup %800  ;;  %v537_v33 = vrot.slane %v475_v16, 4  ;;  %v504_v36 = vadd.f32 %v503_v27, %v502_v8  ;;  %v526_v37 = vadd.f32 %v525_v28, %v441_v48 }
  0x95   : > { %802 = vlog2.f32 %v412_v55  ;;  %v416_v7 = vmul.f32 %v801_v61, %v390_v58  ;;  %v532_v19 = vadd.f32 %v531_v32, %v470_v13  ;;  %v510_v30 = vadd.f32 %v509_v11, %v508_v21 }
  0x96   : > { %v544_v60 = vadd.f32 %v543_v56, %v480_v54  ;;  %v538_v25 = vadd.f32 %v537_v33, %v475_v16  ;;  %v521_v40 = vrot.slane %v520_v14, 2  ;;  %v499_v1 = vrot.slane %v498_v35, 1 }
  0x97   : > { %v719_v26 = vadd.f32 -3.0, %v416_v7  ;;  %v505_v3 = vrot.slane %v504_v36, 1  ;;  %v527_v10 = vrot.slane %v526_v37, 2  ;;  %v533_v24 = vrot.slane %v532_v19, 2 }
  0x98   : > { %v545_v63 = vrot.slane %v544_v60, 2  ;;  %v539_v23 = vrot.slane %v538_v25, 2  ;;  %v511_v43 = vrot.slane %v510_v30, 1  ;;  %v522_v0 = vadd.f32 %v521_v40, %v520_v14 }
  0x99   : > { %v500_v2 = vadd.f32 %v499_v1, %v498_v35  ;;  %v506_v20 = vadd.f32 %v505_v3, %v504_v36  ;;  %v528_v44 = vadd.f32 %v527_v10, %v526_v37  ;;  %v534_v45 = vadd.f32 %v533_v24, %v532_v19 }
  0x9a   : > { %v546_v12 = vadd.f32 %v545_v63, %v544_v60  ;;  %v540_v47 = vadd.f32 %v539_v23, %v538_v25  ;;  %v512_v48 = vadd.f32 %v511_v43, %v510_v30  ;;  %v523_v49 = vrot.slane %v522_v0, 1 }
  0x9b   : > { %v559_v51 = vsel %vm558_vm5, %v506_v20, %v500_v2  ;;  %v535_v6 = vrot.slane %v534_v45, 1  ;;  %vm570_vm11 = vcmask 1047559  }
  0x9c   : > { %v547_v17 = vrot.slane %v546_v12, 1  ;;  %v541_v53 = vrot.slane %v540_v47, 1  ;;  %v524_v54 = vadd.f32 %v523_v49, %v522_v0  ;;  %v561_v55 = vsel %vm560_vm6, %v512_v48, %v559_v51 }
  0x9d   : > { %v536_v58 = vadd.f32 %v535_v6, %v534_v45 }
  0x9e   : > { %v548_v29 = vadd.f32 %v547_v17, %v546_v12  ;;  %v542_v59 = vadd.f32 %v541_v53, %v540_v47 }
  0x9f   : > { %v803_v31 = vpop.eup %802 }
  0xa0   : > { %v414_v9 = vmul.f32 0.6931472, %v803_v31  ;;  %575 = vst [vmem:[%s1269_s11 + $0x8] sm:$0x1] %v548_v29 }
  0xa2   : > { %v418_v34 = vadd.f32 %v719_v26, %v414_v9 }
  0xa4   : > { %v419_v38 = vmul.f32 0.5, %v418_v34 }
  0xa6   : > { %v457_v41 = vmul.f32 %v419_v38, %v1195_v15  ;;  %v529_v15 = vrot.slane %v528_v44, 1 }
  0xa8   : > { %v513_v42 = vrot.slane %v457_v41, 4  ;;  %v530_v57 = vadd.f32 %v529_v15, %v528_v44 }
  0xaa   : > { %v514_v39 = vadd.f32 %v513_v42, %v457_v41 }
  0xac   : > { %v515_v46 = vrot.slane %v514_v39, 2 }
  0xae   : > { %v516_v50 = vadd.f32 %v515_v46, %v514_v39 }
  0xb0   : > { %v517_v52 = vrot.slane %v516_v50, 1 }
  0xb2   : > { %v518_v56 = vadd.f32 %v517_v52, %v516_v50 }
  0xb4   : > { %v563_v60 = vsel %vm562_vm7, %v518_v56, %v561_v55 }
  0xb5   : > { %v565_v61 = vsel %vm564_vm8, %v524_v54, %v563_v60 }
  0xb6   : > { %v567_v62 = vsel %vm566_vm9, %v530_v57, %v565_v61 }
  0xb7   : > { %v569_v63 = vsel %vm568_vm10, %v536_v58, %v567_v62 }
  0xb8   : > { %v571_v4 = vsel %vm570_vm11, %v542_v59, %v569_v63 }
  0xb9   : > { %574 = vst [vmem:[%s1269_s11] sm:$0xff] %v571_v4 }
  0xba PF: > { %s19_s17 = sadd.s32 1, %s948_s17   ;;  %s1316_s12 = smov %s932_s13 }
  0xbb   : > { %p16_p3 = scmp.ge.s32.totalorder %s19_s17, 4   ;;  %s1317_s13 = smov %s936_s14 }
  0xbc   : > { %s1318_s14 = smov %s1023_s23  ;;  %s1319_s15 = smov %s944_s16 }
  0xbd   : > { %s1320_s16 = smov %s1322_s19  ;;  %18 = sbr.rel (!%p16_p3) target bundleno = 8 (0x8), region = 122 }
  0xc4   :  { %597 = vsyncpa [#allocation4], 1 }
  0xc5   :  { %599 = vsyncpa [#allocation4 + $0x1], 1 }
  0xc6   :  { %600 = vsyncpa [#allocation6], 1 }
  0xc7   :  { %602 = vsyncpa [#allocation6 + $0x1], 1 }

</bundles_post_ra>
